<compile_context>
chip_gen: v7x
topology: tpu7x:2x2x1
jax: 0.10.0
libtpu: 0.0.40
codegen_flags: <defaults>
</compile_context>

<pallas_src>
import functools

import numpy as np

import jax
import jax.numpy as jnp
from jax.experimental import pallas as pl
from jax.experimental.pallas import tpu as pltpu


def _fused_conv_pool_kernel(x_ref, w_ref, neg_ref, o_ref, *, dims):
    """One grid step = one batch element: Conv3d -> MaxPool3d, fully in VMEM."""
    (k, Do, Ho, Wo, Dp, Hp, Wp, Cout, K, pk, ps, pp) = dims
    M2 = Do * Ho            # matmul rows: (d, h) conv-output positions
    NL = Wp * Cout          # lane-dense output width (pooled-W x channels)

    # ---- Conv3d: k*k (kd, kh) taps. The W axis and the pk W-pool taps are
    # folded into the lanes of the restructured weight, so each tap is a
    # single lane-dense MXU matmul (default precision, f32 accumulation).
    acc = jnp.zeros((M2, pk * NL), jnp.float32)
    for kd in range(k):
        for kh in range(k):
            xs = x_ref[0, kd:kd + Do, kh:kh + Ho, :]         # (Do, Ho, Wpad*Cin)
            xm = xs.reshape(M2, K)
            acc = acc + jnp.dot(xm, w_ref[kd * k + kh],
                                preferred_element_type=jnp.float32)

    # ---- MaxPool over W: the pk pool taps sit in separate 128-lane blocks;
    # add the precomputed (-inf at invalid taps / 0 elsewhere) bias, then
    # elementwise max across the blocks (vreg-aligned slices -> free selects).
    mw = None
    for dlt in range(pk):
        a = acc[:, dlt * NL:(dlt + 1) * NL] + neg_ref[dlt]   # (M2, NL)
        mw = a if mw is None else jnp.maximum(mw, a)
    mw3 = mw.reshape(Do, Ho, NL)

    # ---- MaxPool over H: plain size-1 slices + max, unrolled over Hp.
    parts_h = []
    for hp in range(Hp):
        cand = None
        for j in range(pk):
            hh = ps * hp + j - pp
            if 0 <= hh < Ho:
                v = mw3[:, hh:hh + 1, :]                     # (Do, 1, NL)
                cand = v if cand is None else jnp.maximum(cand, v)
        parts_h.append(cand)
    mh = jnp.stack(parts_h, axis=0)                          # (Hp, Do, 1, NL)

    # ---- MaxPool over D: leading-dim indexing + max, unrolled over Dp.
    parts_d = []
    for dp in range(Dp):
        cand = None
        for j in range(pk):
            dd = ps * dp + j - pp
            if 0 <= dd < Do:
                v = mh[:, dd, :, :]                          # (Hp, 1, NL)
                cand = v if cand is None else jnp.maximum(cand, v)
        parts_d.append(cand)
    res = jnp.stack(parts_d, axis=0)                         # (Dp, Hp, 1, NL)

    o_ref[0] = res


def tokenizer_forward(x_ncdhw, weight, *, kernel_size=3, stride=1, padding=1,
                      pool_kernel=3, pool_stride=2, pool_padding=1):
    """Tokenizer forward: Conv3d(pad=(p,p,1), bias=False) -> Identity ->
    MaxPool3d(3,2,1) -> Flatten(2,4).transpose(-2,-1).  Returns (N, seq, C)."""
    # TODO(synk): only the module's default config is implemented (stride=1,
    # n_conv_layers=1, Identity activation, max_pool=True, conv_bias=False).
    assert stride == 1, "conv stride != 1 not supported"

    N, Cin, D, H, W = x_ncdhw.shape
    Cout = weight.shape[0]
    k = kernel_size
    pk, ps, pp = pool_kernel, pool_stride, pool_padding
    pd, ph, pw = padding, padding, 1       # Conv3d(padding=(p, p, 1)) per module

    Dpad, Hpad, Wpad = D + 2 * pd, H + 2 * ph, W + 2 * pw
    Do, Ho, Wo = Dpad - k + 1, Hpad - k + 1, Wpad - k + 1
    Dp = (Do + 2 * pp - pk) // ps + 1
    Hp = (Ho + 2 * pp - pk) // ps + 1
    Wp = (Wo + 2 * pp - pk) // ps + 1
    K = Wpad * Cin
    NL = Wp * Cout

    # --- layout plumbing (one cheap pass over the small input): NCDHW ->
    # channels-last, zero-pad for the conv, fuse (W, Cin) into the lane dim.
    x = jnp.transpose(x_ncdhw, (0, 2, 3, 4, 1))
    xp = jnp.pad(x, ((0, 0), (pd, pd), (ph, ph), (pw, pw), (0, 0)))
    xf = xp.reshape(N, Dpad, Hpad, K)

    # --- restructure the conv weight once (tiny, done outside the kernel):
    # for each (kd, kh) tap, a (Wpad*Cin) x (pk*Wp*Cout) matrix producing the
    # conv output at exactly the W positions each pooled-W tap needs, packed
    # lane-dense; out-of-range taps get zero columns (masked to -inf later).
    kw_sel = np.zeros((pk, Wp, Wpad), np.int32)
    valid = np.zeros((pk, Wp, Wpad), np.float32)
    for dlt in range(pk):
        for wp in range(Wp):
            wconv = ps * wp + dlt - pp
            if 0 <= wconv < Wo:
                for kw in range(k):
                    kw_sel[dlt, wp, wconv + kw] = kw
                    valid[dlt, wp, wconv + kw] = 1.0
    w_perm = jnp.transpose(weight, (2, 3, 4, 1, 0))          # (kd,kh,kw,Cin,Cout)
    b6 = w_perm[:, :, kw_sel, :, :]                          # (k,k,pk,Wp,Wpad,Cin,Cout)
    b6 = b6 * jnp.asarray(valid)[None, None, :, :, :, None, None]
    bw = jnp.transpose(b6, (0, 1, 4, 5, 2, 3, 6)).reshape(k * k, K, pk * NL)

    # --- precomputed pool-tap validity bias: 0 where the W-pool tap hits a
    # real conv column, -inf where it falls outside (so the max ignores it).
    neg = np.zeros((pk, 1, Wp, Cout), np.float32)
    for dlt in range(pk):
        for wp in range(Wp):
            if not (0 <= ps * wp + dlt - pp < Wo):
                neg[dlt, 0, wp, :] = -np.inf
    neg = jnp.asarray(neg.reshape(pk, 1, NL))

    dims = (k, Do, Ho, Wo, Dp, Hp, Wp, Cout, K, pk, ps, pp)
    kernel = functools.partial(_fused_conv_pool_kernel, dims=dims)

    out = pl.pallas_call(
        kernel,
        out_shape=jax.ShapeDtypeStruct((N, Dp, Hp, 1, NL), jnp.float32),
        grid_spec=pltpu.PrefetchScalarGridSpec(
            num_scalar_prefetch=0,
            grid=(N,),
            in_specs=[
                pl.BlockSpec((1, Dpad, Hpad, K), lambda n: (n, 0, 0, 0)),
                pl.BlockSpec((k * k, K, pk * NL), lambda n: (0, 0, 0)),
                pl.BlockSpec((pk, 1, NL), lambda n: (0, 0, 0)),
            ],
            out_specs=pl.BlockSpec((1, Dp, Hp, 1, NL),
                                   lambda n: (n, 0, 0, 0, 0)),
        ),
        compiler_params=pltpu.CompilerParams(
            dimension_semantics=("parallel",),
            vmem_limit_bytes=32 * 1024 * 1024),
    )(xf, bw, neg)

    # Flatten(2,4).transpose(-2,-1): rows already enumerate (dp, hp, wp)
    # row-major with channels last -> a free reshape.
    return out.reshape(N, Dp * Hp * Wp, Cout)


if __name__ == "__main__":
    key = jax.random.PRNGKey(0)
    kx, kw = jax.random.split(key)

    # Small shapes: batch=2, in_channels=3, 8^3 volume, 32 output channels.
    N, Cin, D, H, W = 2, 3, 8, 8, 8
    Cout, k = 32, 3
    padding = 1
    x = jax.random.normal(kx, (N, Cin, D, H, W), jnp.float32)

    # kaiming_normal_ (fan_in, relu gain): std = sqrt(2 / (Cin * k^3))
    fan_in = Cin * k ** 3
    weight = jax.random.normal(kw, (Cout, Cin, k, k, k), jnp.float32) \
        * jnp.sqrt(2.0 / fan_in)

    out = tokenizer_forward(x, weight, kernel_size=k, stride=1, padding=padding)
    out = jax.block_until_ready(out)
    assert out.shape == (2, 64, 32), out.shape

    # Reference: XLA conv + reduce_window with the module's exact semantics
    # (conv padding = (padding, padding, 1), pool 3/2/1 with -inf padding).
    ref_conv = jax.lax.conv_general_dilated(
        x, weight, window_strides=(1, 1, 1),
        padding=((padding, padding), (padding, padding), (1, 1)),
        dimension_numbers=("NCDHW", "OIDHW", "NCDHW"))
    ref_pool = jax.lax.reduce_window(
        ref_conv, -jnp.inf, jax.lax.max,
        window_dimensions=(1, 1, 3, 3, 3), window_strides=(1, 1, 2, 2, 2),
        padding=((0, 0), (0, 0), (1, 1), (1, 1), (1, 1)))
    ref = jnp.transpose(ref_pool.reshape(N, Cout, -1), (0, 2, 1))
    max_err = float(jnp.max(jnp.abs(out - ref)))
    assert jnp.allclose(out, ref, atol=2e-2, rtol=2e-2), max_err

    print("KERNEL_OK")
</pallas_src>

<mosaic_0001>
module attributes {stable_mosaic.version = 11 : i64} {
  func.func @_fused_conv_pool_kernel(%arg0: i32, %arg1: memref<1x10x10x30xf32, #tpu.memory_space<vmem>>, %arg2: memref<9x30x384xf32, #tpu.memory_space<vmem>>, %arg3: memref<3x1x128xf32, #tpu.memory_space<vmem>>, %arg4: memref<1x4x4x1x128xf32, #tpu.memory_space<vmem>>) attributes {dimension_semantics = [#tpu.dimension_semantics<parallel>], iteration_bounds = array<i64: 2>, scalar_prefetch = 0 : i64, scratch_operands = 0 : i64, tpu.core_type = #tpu.core_type<tc>, window_params = [{transform_indices = @transform_0, window_bounds = array<i64: 1, 10, 10, 30>}, {pipeline_mode = #tpu.pipeline_mode<synchronous>, transform_indices = @transform_1, window_bounds = array<i64: 9, 30, 384>}, {pipeline_mode = #tpu.pipeline_mode<synchronous>, transform_indices = @transform_2, window_bounds = array<i64: 3, 1, 128>}, {transform_indices = @transform_3, window_bounds = array<i64: 1, 4, 4, 1, 128>}]} {
    %cst = arith.constant 0.000000e+00 : f32
    %0 = vector.broadcast %cst : f32 to vector<64x384xf32>
    %c0 = arith.constant 0 : index
    %c0_0 = arith.constant 0 : index
    %c0_1 = arith.constant 0 : index
    %c0_2 = arith.constant 0 : index
    %1 = vector.load %arg1[%c0, %c0_0, %c0_1, %c0_2] : memref<1x10x10x30xf32, #tpu.memory_space<vmem>>, vector<1x8x8x30xf32>
    %2 = vector.shape_cast %1 : vector<1x8x8x30xf32> to vector<8x8x30xf32>
    %3 = vector.shape_cast %2 : vector<8x8x30xf32> to vector<64x30xf32>
    %c0_3 = arith.constant 0 : index
    %c0_4 = arith.constant 0 : index
    %c0_5 = arith.constant 0 : index
    %4 = vector.load %arg2[%c0_3, %c0_4, %c0_5] : memref<9x30x384xf32, #tpu.memory_space<vmem>>, vector<1x30x384xf32>
    %5 = vector.shape_cast %4 : vector<1x30x384xf32> to vector<30x384xf32>
    %cst_6 = arith.constant dense<0.000000e+00> : vector<64x384xf32>
    %6 = tpu.matmul %3, %5, %cst_6 {dimension_numbers = #tpu.dot_dimension_numbers<[1], [0], [0], [1], [0, 0, 1, 1], [], []>} : vector<64x30xf32>, vector<30x384xf32>, vector<64x384xf32> -> vector<64x384xf32>
    %7 = arith.addf %0, %6 : vector<64x384xf32>
    %c0_7 = arith.constant 0 : index
    %c0_8 = arith.constant 0 : index
    %c1 = arith.constant 1 : index
    %c0_9 = arith.constant 0 : index
    %8 = vector.load %arg1[%c0_7, %c0_8, %c1, %c0_9] : memref<1x10x10x30xf32, #tpu.memory_space<vmem>>, vector<1x8x8x30xf32>
    %9 = vector.shape_cast %8 : vector<1x8x8x30xf32> to vector<8x8x30xf32>
    %10 = vector.shape_cast %9 : vector<8x8x30xf32> to vector<64x30xf32>
    %c1_10 = arith.constant 1 : index
    %c0_11 = arith.constant 0 : index
    %c0_12 = arith.constant 0 : index
    %11 = vector.load %arg2[%c1_10, %c0_11, %c0_12] : memref<9x30x384xf32, #tpu.memory_space<vmem>>, vector<1x30x384xf32>
    %12 = vector.shape_cast %11 : vector<1x30x384xf32> to vector<30x384xf32>
    %cst_13 = arith.constant dense<0.000000e+00> : vector<64x384xf32>
    %13 = tpu.matmul %10, %12, %cst_13 {dimension_numbers = #tpu.dot_dimension_numbers<[1], [0], [0], [1], [0, 0, 1, 1], [], []>} : vector<64x30xf32>, vector<30x384xf32>, vector<64x384xf32> -> vector<64x384xf32>
    %14 = arith.addf %7, %13 : vector<64x384xf32>
    %c0_14 = arith.constant 0 : index
    %c0_15 = arith.constant 0 : index
    %c2 = arith.constant 2 : index
    %c0_16 = arith.constant 0 : index
    %15 = vector.load %arg1[%c0_14, %c0_15, %c2, %c0_16] : memref<1x10x10x30xf32, #tpu.memory_space<vmem>>, vector<1x8x8x30xf32>
    %16 = vector.shape_cast %15 : vector<1x8x8x30xf32> to vector<8x8x30xf32>
    %17 = vector.shape_cast %16 : vector<8x8x30xf32> to vector<64x30xf32>
    %c2_17 = arith.constant 2 : index
    %c0_18 = arith.constant 0 : index
    %c0_19 = arith.constant 0 : index
    %18 = vector.load %arg2[%c2_17, %c0_18, %c0_19] : memref<9x30x384xf32, #tpu.memory_space<vmem>>, vector<1x30x384xf32>
    %19 = vector.shape_cast %18 : vector<1x30x384xf32> to vector<30x384xf32>
    %cst_20 = arith.constant dense<0.000000e+00> : vector<64x384xf32>
    %20 = tpu.matmul %17, %19, %cst_20 {dimension_numbers = #tpu.dot_dimension_numbers<[1], [0], [0], [1], [0, 0, 1, 1], [], []>} : vector<64x30xf32>, vector<30x384xf32>, vector<64x384xf32> -> vector<64x384xf32>
    %21 = arith.addf %14, %20 : vector<64x384xf32>
    %c0_21 = arith.constant 0 : index
    %c1_22 = arith.constant 1 : index
    %c0_23 = arith.constant 0 : index
    %c0_24 = arith.constant 0 : index
    %22 = vector.load %arg1[%c0_21, %c1_22, %c0_23, %c0_24] : memref<1x10x10x30xf32, #tpu.memory_space<vmem>>, vector<1x8x8x30xf32>
    %23 = vector.shape_cast %22 : vector<1x8x8x30xf32> to vector<8x8x30xf32>
    %24 = vector.shape_cast %23 : vector<8x8x30xf32> to vector<64x30xf32>
    %c3 = arith.constant 3 : index
    %c0_25 = arith.constant 0 : index
    %c0_26 = arith.constant 0 : index
    %25 = vector.load %arg2[%c3, %c0_25, %c0_26] : memref<9x30x384xf32, #tpu.memory_space<vmem>>, vector<1x30x384xf32>
    %26 = vector.shape_cast %25 : vector<1x30x384xf32> to vector<30x384xf32>
    %cst_27 = arith.constant dense<0.000000e+00> : vector<64x384xf32>
    %27 = tpu.matmul %24, %26, %cst_27 {dimension_numbers = #tpu.dot_dimension_numbers<[1], [0], [0], [1], [0, 0, 1, 1], [], []>} : vector<64x30xf32>, vector<30x384xf32>, vector<64x384xf32> -> vector<64x384xf32>
    %28 = arith.addf %21, %27 : vector<64x384xf32>
    %c0_28 = arith.constant 0 : index
    %c1_29 = arith.constant 1 : index
    %c1_30 = arith.constant 1 : index
    %c0_31 = arith.constant 0 : index
    %29 = vector.load %arg1[%c0_28, %c1_29, %c1_30, %c0_31] : memref<1x10x10x30xf32, #tpu.memory_space<vmem>>, vector<1x8x8x30xf32>
    %30 = vector.shape_cast %29 : vector<1x8x8x30xf32> to vector<8x8x30xf32>
    %31 = vector.shape_cast %30 : vector<8x8x30xf32> to vector<64x30xf32>
    %c4 = arith.constant 4 : index
    %c0_32 = arith.constant 0 : index
    %c0_33 = arith.constant 0 : index
    %32 = vector.load %arg2[%c4, %c0_32, %c0_33] : memref<9x30x384xf32, #tpu.memory_space<vmem>>, vector<1x30x384xf32>
    %33 = vector.shape_cast %32 : vector<1x30x384xf32> to vector<30x384xf32>
    %cst_34 = arith.constant dense<0.000000e+00> : vector<64x384xf32>
    %34 = tpu.matmul %31, %33, %cst_34 {dimension_numbers = #tpu.dot_dimension_numbers<[1], [0], [0], [1], [0, 0, 1, 1], [], []>} : vector<64x30xf32>, vector<30x384xf32>, vector<64x384xf32> -> vector<64x384xf32>
    %35 = arith.addf %28, %34 : vector<64x384xf32>
    %c0_35 = arith.constant 0 : index
    %c1_36 = arith.constant 1 : index
    %c2_37 = arith.constant 2 : index
    %c0_38 = arith.constant 0 : index
    %36 = vector.load %arg1[%c0_35, %c1_36, %c2_37, %c0_38] : memref<1x10x10x30xf32, #tpu.memory_space<vmem>>, vector<1x8x8x30xf32>
    %37 = vector.shape_cast %36 : vector<1x8x8x30xf32> to vector<8x8x30xf32>
    %38 = vector.shape_cast %37 : vector<8x8x30xf32> to vector<64x30xf32>
    %c5 = arith.constant 5 : index
    %c0_39 = arith.constant 0 : index
    %c0_40 = arith.constant 0 : index
    %39 = vector.load %arg2[%c5, %c0_39, %c0_40] : memref<9x30x384xf32, #tpu.memory_space<vmem>>, vector<1x30x384xf32>
    %40 = vector.shape_cast %39 : vector<1x30x384xf32> to vector<30x384xf32>
    %cst_41 = arith.constant dense<0.000000e+00> : vector<64x384xf32>
    %41 = tpu.matmul %38, %40, %cst_41 {dimension_numbers = #tpu.dot_dimension_numbers<[1], [0], [0], [1], [0, 0, 1, 1], [], []>} : vector<64x30xf32>, vector<30x384xf32>, vector<64x384xf32> -> vector<64x384xf32>
    %42 = arith.addf %35, %41 : vector<64x384xf32>
    %c0_42 = arith.constant 0 : index
    %c2_43 = arith.constant 2 : index
    %c0_44 = arith.constant 0 : index
    %c0_45 = arith.constant 0 : index
    %43 = vector.load %arg1[%c0_42, %c2_43, %c0_44, %c0_45] : memref<1x10x10x30xf32, #tpu.memory_space<vmem>>, vector<1x8x8x30xf32>
    %44 = vector.shape_cast %43 : vector<1x8x8x30xf32> to vector<8x8x30xf32>
    %45 = vector.shape_cast %44 : vector<8x8x30xf32> to vector<64x30xf32>
    %c6 = arith.constant 6 : index
    %c0_46 = arith.constant 0 : index
    %c0_47 = arith.constant 0 : index
    %46 = vector.load %arg2[%c6, %c0_46, %c0_47] : memref<9x30x384xf32, #tpu.memory_space<vmem>>, vector<1x30x384xf32>
    %47 = vector.shape_cast %46 : vector<1x30x384xf32> to vector<30x384xf32>
    %cst_48 = arith.constant dense<0.000000e+00> : vector<64x384xf32>
    %48 = tpu.matmul %45, %47, %cst_48 {dimension_numbers = #tpu.dot_dimension_numbers<[1], [0], [0], [1], [0, 0, 1, 1], [], []>} : vector<64x30xf32>, vector<30x384xf32>, vector<64x384xf32> -> vector<64x384xf32>
    %49 = arith.addf %42, %48 : vector<64x384xf32>
    %c0_49 = arith.constant 0 : index
    %c2_50 = arith.constant 2 : index
    %c1_51 = arith.constant 1 : index
    %c0_52 = arith.constant 0 : index
    %50 = vector.load %arg1[%c0_49, %c2_50, %c1_51, %c0_52] : memref<1x10x10x30xf32, #tpu.memory_space<vmem>>, vector<1x8x8x30xf32>
    %51 = vector.shape_cast %50 : vector<1x8x8x30xf32> to vector<8x8x30xf32>
    %52 = vector.shape_cast %51 : vector<8x8x30xf32> to vector<64x30xf32>
    %c7 = arith.constant 7 : index
    %c0_53 = arith.constant 0 : index
    %c0_54 = arith.constant 0 : index
    %53 = vector.load %arg2[%c7, %c0_53, %c0_54] : memref<9x30x384xf32, #tpu.memory_space<vmem>>, vector<1x30x384xf32>
    %54 = vector.shape_cast %53 : vector<1x30x384xf32> to vector<30x384xf32>
    %cst_55 = arith.constant dense<0.000000e+00> : vector<64x384xf32>
    %55 = tpu.matmul %52, %54, %cst_55 {dimension_numbers = #tpu.dot_dimension_numbers<[1], [0], [0], [1], [0, 0, 1, 1], [], []>} : vector<64x30xf32>, vector<30x384xf32>, vector<64x384xf32> -> vector<64x384xf32>
    %56 = arith.addf %49, %55 : vector<64x384xf32>
    %c0_56 = arith.constant 0 : index
    %c2_57 = arith.constant 2 : index
    %c2_58 = arith.constant 2 : index
    %c0_59 = arith.constant 0 : index
    %57 = vector.load %arg1[%c0_56, %c2_57, %c2_58, %c0_59] : memref<1x10x10x30xf32, #tpu.memory_space<vmem>>, vector<1x8x8x30xf32>
    %58 = vector.shape_cast %57 : vector<1x8x8x30xf32> to vector<8x8x30xf32>
    %59 = vector.shape_cast %58 : vector<8x8x30xf32> to vector<64x30xf32>
    %c8 = arith.constant 8 : index
    %c0_60 = arith.constant 0 : index
    %c0_61 = arith.constant 0 : index
    %60 = vector.load %arg2[%c8, %c0_60, %c0_61] : memref<9x30x384xf32, #tpu.memory_space<vmem>>, vector<1x30x384xf32>
    %61 = vector.shape_cast %60 : vector<1x30x384xf32> to vector<30x384xf32>
    %cst_62 = arith.constant dense<0.000000e+00> : vector<64x384xf32>
    %62 = tpu.matmul %59, %61, %cst_62 {dimension_numbers = #tpu.dot_dimension_numbers<[1], [0], [0], [1], [0, 0, 1, 1], [], []>} : vector<64x30xf32>, vector<30x384xf32>, vector<64x384xf32> -> vector<64x384xf32>
    %63 = arith.addf %56, %62 : vector<64x384xf32>
    %64 = vector.extract_strided_slice %63 {offsets = [0, 0], sizes = [64, 128], strides = [1, 1]} : vector<64x384xf32> to vector<64x128xf32>
    %c0_63 = arith.constant 0 : index
    %c0_64 = arith.constant 0 : index
    %c0_65 = arith.constant 0 : index
    %65 = vector.load %arg3[%c0_63, %c0_64, %c0_65] : memref<3x1x128xf32, #tpu.memory_space<vmem>>, vector<1x1x128xf32>
    %66 = vector.shape_cast %65 : vector<1x1x128xf32> to vector<1x128xf32>
    %67 = vector.broadcast %66 : vector<1x128xf32> to vector<64x128xf32>
    %68 = arith.addf %64, %67 : vector<64x128xf32>
    %69 = vector.extract_strided_slice %63 {offsets = [0, 128], sizes = [64, 128], strides = [1, 1]} : vector<64x384xf32> to vector<64x128xf32>
    %c1_66 = arith.constant 1 : index
    %c0_67 = arith.constant 0 : index
    %c0_68 = arith.constant 0 : index
    %70 = vector.load %arg3[%c1_66, %c0_67, %c0_68] : memref<3x1x128xf32, #tpu.memory_space<vmem>>, vector<1x1x128xf32>
    %71 = vector.shape_cast %70 : vector<1x1x128xf32> to vector<1x128xf32>
    %72 = vector.broadcast %71 : vector<1x128xf32> to vector<64x128xf32>
    %73 = arith.addf %69, %72 : vector<64x128xf32>
    %74 = arith.maximumf %68, %73 : vector<64x128xf32>
    %75 = vector.extract_strided_slice %63 {offsets = [0, 256], sizes = [64, 128], strides = [1, 1]} : vector<64x384xf32> to vector<64x128xf32>
    %c2_69 = arith.constant 2 : index
    %c0_70 = arith.constant 0 : index
    %c0_71 = arith.constant 0 : index
    %76 = vector.load %arg3[%c2_69, %c0_70, %c0_71] : memref<3x1x128xf32, #tpu.memory_space<vmem>>, vector<1x1x128xf32>
    %77 = vector.shape_cast %76 : vector<1x1x128xf32> to vector<1x128xf32>
    %78 = vector.broadcast %77 : vector<1x128xf32> to vector<64x128xf32>
    %79 = arith.addf %75, %78 : vector<64x128xf32>
    %80 = arith.maximumf %74, %79 : vector<64x128xf32>
    %81 = vector.shape_cast %80 : vector<64x128xf32> to vector<8x8x128xf32>
    %82 = vector.extract_strided_slice %81 {offsets = [0, 0, 0], sizes = [8, 1, 128], strides = [1, 1, 1]} : vector<8x8x128xf32> to vector<8x1x128xf32>
    %83 = vector.extract_strided_slice %81 {offsets = [0, 1, 0], sizes = [8, 1, 128], strides = [1, 1, 1]} : vector<8x8x128xf32> to vector<8x1x128xf32>
    %84 = arith.maximumf %82, %83 : vector<8x1x128xf32>
    %85 = vector.extract_strided_slice %81 {offsets = [0, 1, 0], sizes = [8, 1, 128], strides = [1, 1, 1]} : vector<8x8x128xf32> to vector<8x1x128xf32>
    %86 = vector.extract_strided_slice %81 {offsets = [0, 2, 0], sizes = [8, 1, 128], strides = [1, 1, 1]} : vector<8x8x128xf32> to vector<8x1x128xf32>
    %87 = arith.maximumf %85, %86 : vector<8x1x128xf32>
    %88 = vector.extract_strided_slice %81 {offsets = [0, 3, 0], sizes = [8, 1, 128], strides = [1, 1, 1]} : vector<8x8x128xf32> to vector<8x1x128xf32>
    %89 = arith.maximumf %87, %88 : vector<8x1x128xf32>
    %90 = vector.extract_strided_slice %81 {offsets = [0, 3, 0], sizes = [8, 1, 128], strides = [1, 1, 1]} : vector<8x8x128xf32> to vector<8x1x128xf32>
    %91 = vector.extract_strided_slice %81 {offsets = [0, 4, 0], sizes = [8, 1, 128], strides = [1, 1, 1]} : vector<8x8x128xf32> to vector<8x1x128xf32>
    %92 = arith.maximumf %90, %91 : vector<8x1x128xf32>
    %93 = vector.extract_strided_slice %81 {offsets = [0, 5, 0], sizes = [8, 1, 128], strides = [1, 1, 1]} : vector<8x8x128xf32> to vector<8x1x128xf32>
    %94 = arith.maximumf %92, %93 : vector<8x1x128xf32>
    %95 = vector.extract_strided_slice %81 {offsets = [0, 5, 0], sizes = [8, 1, 128], strides = [1, 1, 1]} : vector<8x8x128xf32> to vector<8x1x128xf32>
    %96 = vector.extract_strided_slice %81 {offsets = [0, 6, 0], sizes = [8, 1, 128], strides = [1, 1, 1]} : vector<8x8x128xf32> to vector<8x1x128xf32>
    %97 = arith.maximumf %95, %96 : vector<8x1x128xf32>
    %98 = vector.extract_strided_slice %81 {offsets = [0, 7, 0], sizes = [8, 1, 128], strides = [1, 1, 1]} : vector<8x8x128xf32> to vector<8x1x128xf32>
    %99 = arith.maximumf %97, %98 : vector<8x1x128xf32>
    %100 = vector.shape_cast %84 : vector<8x1x128xf32> to vector<1x8x1x128xf32>
    %101 = vector.shape_cast %89 : vector<8x1x128xf32> to vector<1x8x1x128xf32>
    %102 = vector.shape_cast %94 : vector<8x1x128xf32> to vector<1x8x1x128xf32>
    %103 = vector.shape_cast %99 : vector<8x1x128xf32> to vector<1x8x1x128xf32>
    %104 = tpu.concatenate %100, %101, %102, %103 in 0 : vector<1x8x1x128xf32>, vector<1x8x1x128xf32>, vector<1x8x1x128xf32>, vector<1x8x1x128xf32> -> vector<4x8x1x128xf32>
    %105 = vector.extract_strided_slice %104 {offsets = [0, 0, 0, 0], sizes = [4, 1, 1, 128], strides = [1, 1, 1, 1]} : vector<4x8x1x128xf32> to vector<4x1x1x128xf32>
    %106 = vector.shape_cast %105 : vector<4x1x1x128xf32> to vector<4x1x128xf32>
    %107 = vector.extract_strided_slice %104 {offsets = [0, 1, 0, 0], sizes = [4, 1, 1, 128], strides = [1, 1, 1, 1]} : vector<4x8x1x128xf32> to vector<4x1x1x128xf32>
    %108 = vector.shape_cast %107 : vector<4x1x1x128xf32> to vector<4x1x128xf32>
    %109 = arith.maximumf %106, %108 : vector<4x1x128xf32>
    %110 = vector.extract_strided_slice %104 {offsets = [0, 1, 0, 0], sizes = [4, 1, 1, 128], strides = [1, 1, 1, 1]} : vector<4x8x1x128xf32> to vector<4x1x1x128xf32>
    %111 = vector.shape_cast %110 : vector<4x1x1x128xf32> to vector<4x1x128xf32>
    %112 = vector.extract_strided_slice %104 {offsets = [0, 2, 0, 0], sizes = [4, 1, 1, 128], strides = [1, 1, 1, 1]} : vector<4x8x1x128xf32> to vector<4x1x1x128xf32>
    %113 = vector.shape_cast %112 : vector<4x1x1x128xf32> to vector<4x1x128xf32>
    %114 = arith.maximumf %111, %113 : vector<4x1x128xf32>
    %115 = vector.extract_strided_slice %104 {offsets = [0, 3, 0, 0], sizes = [4, 1, 1, 128], strides = [1, 1, 1, 1]} : vector<4x8x1x128xf32> to vector<4x1x1x128xf32>
    %116 = vector.shape_cast %115 : vector<4x1x1x128xf32> to vector<4x1x128xf32>
    %117 = arith.maximumf %114, %116 : vector<4x1x128xf32>
    %118 = vector.extract_strided_slice %104 {offsets = [0, 3, 0, 0], sizes = [4, 1, 1, 128], strides = [1, 1, 1, 1]} : vector<4x8x1x128xf32> to vector<4x1x1x128xf32>
    %119 = vector.shape_cast %118 : vector<4x1x1x128xf32> to vector<4x1x128xf32>
    %120 = vector.extract_strided_slice %104 {offsets = [0, 4, 0, 0], sizes = [4, 1, 1, 128], strides = [1, 1, 1, 1]} : vector<4x8x1x128xf32> to vector<4x1x1x128xf32>
    %121 = vector.shape_cast %120 : vector<4x1x1x128xf32> to vector<4x1x128xf32>
    %122 = arith.maximumf %119, %121 : vector<4x1x128xf32>
    %123 = vector.extract_strided_slice %104 {offsets = [0, 5, 0, 0], sizes = [4, 1, 1, 128], strides = [1, 1, 1, 1]} : vector<4x8x1x128xf32> to vector<4x1x1x128xf32>
    %124 = vector.shape_cast %123 : vector<4x1x1x128xf32> to vector<4x1x128xf32>
    %125 = arith.maximumf %122, %124 : vector<4x1x128xf32>
    %126 = vector.extract_strided_slice %104 {offsets = [0, 5, 0, 0], sizes = [4, 1, 1, 128], strides = [1, 1, 1, 1]} : vector<4x8x1x128xf32> to vector<4x1x1x128xf32>
    %127 = vector.shape_cast %126 : vector<4x1x1x128xf32> to vector<4x1x128xf32>
    %128 = vector.extract_strided_slice %104 {offsets = [0, 6, 0, 0], sizes = [4, 1, 1, 128], strides = [1, 1, 1, 1]} : vector<4x8x1x128xf32> to vector<4x1x1x128xf32>
    %129 = vector.shape_cast %128 : vector<4x1x1x128xf32> to vector<4x1x128xf32>
    %130 = arith.maximumf %127, %129 : vector<4x1x128xf32>
    %131 = vector.extract_strided_slice %104 {offsets = [0, 7, 0, 0], sizes = [4, 1, 1, 128], strides = [1, 1, 1, 1]} : vector<4x8x1x128xf32> to vector<4x1x1x128xf32>
    %132 = vector.shape_cast %131 : vector<4x1x1x128xf32> to vector<4x1x128xf32>
    %133 = arith.maximumf %130, %132 : vector<4x1x128xf32>
    %134 = vector.shape_cast %109 : vector<4x1x128xf32> to vector<1x4x1x128xf32>
    %135 = vector.shape_cast %117 : vector<4x1x128xf32> to vector<1x4x1x128xf32>
    %136 = vector.shape_cast %125 : vector<4x1x128xf32> to vector<1x4x1x128xf32>
    %137 = vector.shape_cast %133 : vector<4x1x128xf32> to vector<1x4x1x128xf32>
    %138 = tpu.concatenate %134, %135, %136, %137 in 0 : vector<1x4x1x128xf32>, vector<1x4x1x128xf32>, vector<1x4x1x128xf32>, vector<1x4x1x128xf32> -> vector<4x4x1x128xf32>
    %c0_72 = arith.constant 0 : index
    %c0_73 = arith.constant 0 : index
    %c0_74 = arith.constant 0 : index
    %c0_75 = arith.constant 0 : index
    %c0_76 = arith.constant 0 : index
    %139 = vector.load %arg4[%c0_72, %c0_73, %c0_74, %c0_75, %c0_76] : memref<1x4x4x1x128xf32, #tpu.memory_space<vmem>>, vector<1x4x4x1x128xf32>
    %140 = vector.shape_cast %139 : vector<1x4x4x1x128xf32> to vector<4x4x1x128xf32>
    %141 = vector.shape_cast %138 : vector<4x4x1x128xf32> to vector<1x4x4x1x128xf32>
    tpu.vector_store %arg4[%c0_72, %c0_73, %c0_74, %c0_75, %c0_76], %141 {strides = array<i32>} : memref<1x4x4x1x128xf32, #tpu.memory_space<vmem>>, vector<1x4x4x1x128xf32>,
    return
  }
  func.func @transform_0(%arg0: i32) -> (i32, i32, i32, i32) {
    %c0_i32 = arith.constant 0 : i32
    %c0_i32_0 = arith.constant 0 : i32
    %c0_i32_1 = arith.constant 0 : i32
    %c0_i32_2 = arith.constant 0 : i32
    return %arg0, %c0_i32, %c0_i32_0, %c0_i32_1 : i32, i32, i32, i32
  }
  func.func @transform_1(%arg0: i32) -> (i32, i32, i32) {
    %c0_i32 = arith.constant 0 : i32
    %c0_i32_0 = arith.constant 0 : i32
    %c0_i32_1 = arith.constant 0 : i32
    %c0_i32_2 = arith.constant 0 : i32
    return %c0_i32, %c0_i32_0, %c0_i32_1 : i32, i32, i32
  }
  func.func @transform_2(%arg0: i32) -> (i32, i32, i32) {
    %c0_i32 = arith.constant 0 : i32
    %c0_i32_0 = arith.constant 0 : i32
    %c0_i32_1 = arith.constant 0 : i32
    %c0_i32_2 = arith.constant 0 : i32
    return %c0_i32, %c0_i32_0, %c0_i32_1 : i32, i32, i32
  }
  func.func @transform_3(%arg0: i32) -> (i32, i32, i32, i32, i32) {
    %c0_i32 = arith.constant 0 : i32
    %c0_i32_0 = arith.constant 0 : i32
    %c0_i32_1 = arith.constant 0 : i32
    %c0_i32_2 = arith.constant 0 : i32
    %c0_i32_3 = arith.constant 0 : i32
    return %arg0, %c0_i32, %c0_i32_0, %c0_i32_1, %c0_i32_2 : i32, i32, i32, i32, i32
  }
}

</mosaic_0001>

<bundles_post_ra>
// kernel: tpu_custom_call.1
= control target key start
LH: loop header
LB: loop body
LE: loop exit
PB: predicated region body
PF: predicated region fallthrough
CT: control target
= control target key end

     0   :  { %8 = vsyncpa [#allocation3], 0  ;;  %s4963_s0 = inlined_call_operand.vmem [shape: f32[2,10,10,30], index: 0, kind: input, shape index: {}]   ;;  %s4964_s1 = inlined_call_operand.hbm [shape: f32[9,30,384], index: 1, kind: input, shape index: {}]   ;;  %s4965_s2 = inlined_call_operand.vmem [shape: f32[3,1,128], index: 2, kind: input, shape index: {}]   ;;  %s4966_s3 = inlined_call_operand.hbm [shape: f32[2,4,4,1,128], index: 3, kind: output, shape index: {}]  }
   0x1   :  { %9 = vsyncpa [#allocation4], 0 }
   0x2   :  { %11 = vsyncpa [#allocation4 + $0x1], 0  ;;  %s4193_s12 = smov 0   ;;  %s4195_s13 = smov 0  }
   0x3   :  { %s4197_s14 = smov 0   ;;  %s4199_s15 = smov 0  }
   0x4 LB: > { %s4214_s16 = sadd.s32 4294967295, %s4163_s15   ;;  %s3110_s17 = sadd.s32 4294967294, %s4163_s15   ;;  %s4163_s15 = sphi %s4199_s15, %s4984_s15   ;;  %s4159_s14 = sphi %s4197_s14, %s4983_s14   ;;  %s4155_s13 = sphi %s4195_s13, %s4982_s13   ;;  %s4151_s12 = sphi %s4193_s12, %s4981_s12  }
   0x5   : > { %s4218_s18 = sadd.s32 1, %s4163_s15   ;;  %s92_s19 = sadd.s32 1, %s4159_s14 }
   0x6   : > { %s89_s20 = ssub.s32 %s4163_s15, %s4218_s18  ;;  %p102_p0 = scmp.ne.s32.totalorder %s4159_s14, %s4155_s13 }
   0x7   : > { %p90_p1 = scmp.eq.s32.totalorder %s89_s20, 0  ;;  %p103_p2 = scmp.eq.s32.totalorder %s4214_s16, 1 }
   0x8   : > { %p108_p3 = scmp.ne.s32.totalorder %s4155_s13, %s4151_s12  ;;  %p109_p4 = scmp.eq.s32.totalorder %s3110_s17, 1 }
   0x9   : > { %s4229_s21 = scalar_select %p90_p1, %s4159_s14, %s92_s19  }
   0xa   : > { %p4231_p5 = por %p103_p2, %p102_p0  ;;  %p4235_p6 = por %p109_p4, %p108_p3 }
   0xb   : > { %p3111_p7 = scmp.ge.s32.totalorder %s4163_s15, 1  ;;  %p116_p8 = scmp.lt.s32.totalorder %s4163_s15, 3 }
   0xc   : > { %s4970_s22 = scalar_select %p4231_p5, 1, 0 }
   0xd   : > { %s4971_s23 = scalar_select %p4235_p6, 1, 0 }
   0xe   : > { %p4967_p9 = scmp.eq.s32.totalorder %s4214_s16, 0  ;;  %p4242_p10 = pnand %p3111_p7, %p116_p8 }
   0xf   : > { %s4165_s25 = smov [#allocation2]   ;;  %s4069_s30 = scalar_lea.hbm %s4964_s1, 13824 }
  0x10   : > { %s4972_s24 = scalar_select %p4242_p10, 1, 0 }
  0x11   : > { %s128_s26 = sshll.u32 %s4165_s25, 4  ;;  %p4019_p11 = pneg %p4242_p10  ;;  %s129_s26 = int_to_ptr.vmem [resolvable:$true] %s128_s26 }
  0x12   : > { %p4070_p13 = scmp.ne.s32.totalorder %s4964_s1, %s4069_s30  ;;  %p4076_p3 = scmp.lt.u32.totalorder %s4069_s30, %s4964_s1 }
  0x13   : > { %p4250_p12 = pnand %p4967_p9, %p4019_p11 }
  0x15   : > { %p4071_p0 = pneg %p4250_p12 }
  0x17   : > { %p4072_p1 = pnand %p4071_p0, %p4070_p13 }
  0x19   : > { %p4073_p2 = pneg %p4072_p1 }
  0x1b   : > { %p4078_p4 = pnand %p4076_p3, %p4073_p2 }
  0x1d   : > { %4081 = shalt.err (!%p4078_p4)
}
  0x1e   : > { %s4082_s8 = scalar_lea.vmem %s129_s26, 13824  ;;  %p4090_p9 = scmp.lt.s32.totalorder %s129_s26, %s129_s26 }
  0x1f   : > { %p4083_p7 = scmp.ne.s32.totalorder %s129_s26, %s4082_s8  ;;  %p4091_p6 = scmp.lt.s32.totalorder %s4082_s8, %s4082_s8 }
  0x21   : > { %p4085_p8 = pnand %p4083_p7, %p4071_p0  ;;  %p4092_p5 = por %p4091_p6, %p4090_p9 }
  0x23   : > { %p4086_p11 = pneg %p4085_p8 }
  0x25   : > { %p4093_p10 = pnand %p4092_p5, %p4086_p11 }
  0x27   : > { %4096 = shalt.err (!%p4093_p10)
}
  0x28   : > { %s4166_s9 = smov 384   ;;  %s4167_s10 = smov 24  }
  0x29   : > { %4022 = dma.hbm_to_vmem [thread:$0]  (!%p4250_p12), %s4964_s1, 13824, %s129_s26, [#allocation3], %s4166_s9, %s4166_s9, %s4167_s10  }
  0x2a   : > { %p4974_p13 = scmp.ne.s32.totalorder %s4972_s24, 0 }
  0x2b   : > { %p4975_p1 = scmp.eq.s32.totalorder (!%p4974_p13), %s4214_s16, 0 }
  0x2c   : > { %155 = sbr.rel (%p4974_p13) target bundleno = 531 (0x213), region = 32 }
  0x33   : > { %4142 = dma.done.wait (%p4975_p1), [#allocation3], 13824   ;;  %p4976_p0 = pmov %p4975_p1 }
  0x34   : > { %p179_p5 = scmp.lt.s32.totalorder %s4214_s16, 1  ;;  %v4168_v0 = vmov 0.0   ;;  %vm250_vm0 = vcmask 1045504   ;;  %vm4169_vm1 = vmmov 1   ;;  %v214_v2 = vld [vmem:[#allocation2 + $0x68] sm:$0xff]  ;;  %v217_v3 = vld [vmem:[#allocation2 + $0x80] sm:$0xff] }
  0x35   : > { %4144 = vsyncadd (%p4976_p0), [#allocation3], 4294953472  ;;  %324 = vmatprep.mubr.f32.mxu1 %v4168_v0  ;;  %847 = vmatprep.mubr.f32.mxu0 %v4168_v0  ;;  %v739_v4 = vld [vmem:[#allocation2 + $0xc8] sm:$0xff]  ;;  %v3636_v5 = vpack.c.bf16 %v217_v3, %v214_v2  ;;  %v742_v6 = vld [vmem:[#allocation2 + $0xe0] sm:$0xff]  ;;  %vm225_vm3 = vcmask 244736   ;;  %s176_s6 = sand.u32 1, %s4155_s13  }
  0x36   : > { %s4280_s19 = scalar_select %p179_p5, %s4214_s16, 1  ;;  %vm4282_vm2 = vmpackc.low %vm250_vm0, %vm4169_vm1  ;;  %v213_v7 = vld [vmem:[#allocation2 + $0x60] sm:$0xff]  ;;  %v216_v8 = vld [vmem:[#allocation2 + $0x78] sm:$0xff]  ;;  %v4287_v9 = vpack.c.bf16 %v742_v6, %v739_v4 }
  0x37   : > { %v3638_v10 = vpack.c.bf16 %v216_v8, %v213_v7  ;;  %v738_v11 = vld [vmem:[#allocation2 + $0xc0] sm:$0xff]  ;;  %v741_v12 = vld [vmem:[#allocation2 + $0xd8] sm:$0xff]  ;;  %3637 = vmatprep.subr.bf16.mxu1 %v3636_v5  ;;  %v223_v15 = vld [vmem:[#allocation2 + $0xb0] sm:$0x3f]  ;;  %s4863_s7 = sshll.u32 %s176_s6, 4  ;;  %s3347_s9 = sshll.u32 %s4214_s16, 8 }
  0x38   : > { %s4012_s20 = smul.u32 160, %s4280_s19  ;;  %v220_v13 = vld [vmem:[#allocation2 + $0x98] sm:$0xff]  ;;  %v4289_v14 = vpack.c.bf16 %v741_v12, %v738_v11  ;;  %v748_v17 = vld [vmem:[#allocation2 + $0x110] sm:$0x3f]  ;;  %3677 = vmatprep.subr.bf16.mxu0 %v4287_v9  ;;  %v222_v21 = vld [vmem:[#allocation2 + $0xa8] sm:$0x3f]  ;;  %s4913_s19 = scalar_lea.hbm %s4966_s3, %s3347_s9 }
  0x39   : > { %v745_v16 = vld [vmem:[#allocation2 + $0xf8] sm:$0xff]  ;;  %3639 = vmatpush1.bf16.msra.mxu1 %v3638_v10  ;;  %v3640_v18 = vpack.c.bf16 %v223_v15, %v220_v13  ;;  %v219_v20 = vld [vmem:[#allocation2 + $0x90] sm:$0xff]  ;;  %v747_v24 = vld [vmem:[#allocation2 + $0x108] sm:$0x3f]  ;;  %s4873_s8 = scalar_lea.vmem [#allocation5], %s4863_s7  ;;  %s4922_s16 = scalar_lea.sflag [#allocation4], %s176_s6 }
  0x3a   : > { %v4292_v19 = vpack.c.bf16 %v748_v17, %v745_v16  ;;  %v744_v22 = vld [vmem:[#allocation2 + $0xf0] sm:$0xff]  ;;  %3679 = vmatpush1.bf16.msra.mxu0 %v4289_v14  ;;  %v3643_v23 = vpack.c.bf16 %v222_v21, %v219_v20  ;;  %s4298_s26 = scalar_lea.vmem %s4963_s0, %s4012_s20  ;;  %v1036_v26 = vld [vmem:[#allocation2 + $0x128] sm:$0xff]  ;;  %v1039_v27 = vld [vmem:[#allocation2 + $0x140] sm:$0xff]  ;;  %s3036_s10 = sshll.u32 %s4873_s8, 4  ;;  %s4915_s10 = int_to_ptr.vmem [resolvable:$true] %s3036_s10 }
  0x3b   : > { %3642 = vmatprep.subr.msk.bf16.mxu1 %vm4282_vm2, %v3640_v18  ;;  %v4305_v25 = vpack.c.bf16 %v747_v24, %v744_v22  ;;  %v1035_v28 = vld [vmem:[#allocation2 + $0x120] sm:$0xff]  ;;  %v3696_v29 = vpack.c.bf16 %v1039_v27, %v1036_v26  ;;  %v1038_v30 = vld [vmem:[#allocation2 + $0x138] sm:$0xff]  ;;  %v215_v31 = vld [vmem:[#allocation2 + $0x70] sm:$0xff]  ;;  %s4097_s20 = scalar_lea.vmem %s4915_s10, 256  ;;  %p4979_p9 = scmp.ne.s32.totalorder %s4970_s22, 0 }
  0x3c   : > { %3682 = vmatprep.subr.msk.bf16.mxu0 %vm4282_vm2, %v4292_v19  ;;  %v218_v32 = vld [vmem:[#allocation2 + $0x88] sm:$0xff]  ;;  %v3698_v36 = vpack.c.bf16 %v1038_v30, %v1035_v28  ;;  %v1042_v37 = vld [vmem:[#allocation2 + $0x158] sm:$0xff]  ;;  %v1045_v38 = vld [vmem:[#allocation2 + $0x170] sm:$0x3f]  ;;  %p4098_p6 = scmp.ne.s32.totalorder %s4915_s10, %s4097_s20  ;;  %s4170_s24 = smov [#allocation5]  }
  0x3d   : > { %3645 = vmatpush1.bf16.msk.msra.mxu1 %vm4282_vm2, %v3643_v23  ;;  %v4310_v33 = vld [vmem:[%s4298_s26 + $0x1] sm:$0xff]  ;;  %v3646_v34 = vpack.c.bf16 %v218_v32, %v215_v31  ;;  %v1041_v39 = vld [vmem:[#allocation2 + $0x150] sm:$0xff]  ;;  %v3700_v40 = vpack.c.bf16 %v1045_v38, %v1042_v37  ;;  %v224_v44 = vld [vmem:[#allocation2 + $0xb8] sm:$0x3f]  ;;  %s4101_s25 = sshll.u32 %s4170_s24, 4  ;;  %s4102_s25 = int_to_ptr.vmem [resolvable:$false] %s4101_s25 }
  0x3e   : > { %3685 = vmatpush1.bf16.msk.msra.mxu0 %vm4282_vm2, %v4305_v25  ;;  %v4316_v35 = vld [vmem:[%s4298_s26 + $0x2] sm:$0xff]  ;;  %v4324_v42 = vld [vmem:[%s4298_s26 + $0x11] sm:$0xff]  ;;  %p4099_p10 = pnand %p4098_p6, %p4979_p9  ;;  %p4104_p2 = scmp.lt.s32.totalorder %s4915_s10, %s4102_s25 }
  0x3f   : > { %3697 = vmatprep.subr.bf16.mxu0 %v3696_v29  ;;  %3647 = vmatprep.subr.bf16.mxu1 %v3646_v34  ;;  %v1044_v41 = vld [vmem:[#allocation2 + $0x168] sm:$0x3f]  ;;  %v221_v43 = vld [vmem:[#allocation2 + $0xa0] sm:$0xff]  ;;  %v4327_v45 = vld [vmem:[%s4298_s26 + $0x12] sm:$0xff] }
  0x40   : > { %3120 = vmatmul.mubr.msk.f32.vlgmr.msra.gmra.mrb[0].mxu1 %vm225_vm3, %v4310_v33  ;;  %v3703_v46 = vpack.c.bf16 %v1044_v41, %v1041_v39  ;;  %v3650_v47 = vpack.c.bf16 %v224_v44, %v221_v43  ;;  %v1332_v48 = vld [vmem:[#allocation2 + $0x188] sm:$0xff]  ;;  %v1335_v49 = vld [vmem:[#allocation2 + $0x1a0] sm:$0xff]  ;;  %v4356_v56 = vld [vmem:[%s4298_s26 + $0x31] sm:$0xff]  ;;  %p4100_p12 = pneg %p4099_p10 }
  0x41   : > { %3158 = vmatmul.mubr.msk.f32.vlgmr.msra.gmra.mrb[0].mxu0 %vm225_vm3, %v4316_v35  ;;  %330 = vmatprep.mubr.f32.mxu1 %v4168_v0  ;;  %v3716_v50 = vpack.c.bf16 %v1335_v49, %v1332_v48  ;;  %v4340_v51 = vld [vmem:[%s4298_s26 + $0x21] sm:$0xff]  ;;  %v4360_v57 = vld [vmem:[%s4298_s26 + $0x32] sm:$0xff] }
  0x42   : > { %3699 = vmatpush1.bf16.msra.mxu0 %v3698_v36  ;;  %3649 = vmatpush3.bf16.msra.mxu1 %v3646_v34  ;;  %v193_v52 = vld [vmem:[#allocation2 + $0x8] sm:$0xff]  ;;  %v196_v53 = vld [vmem:[#allocation2 + $0x20] sm:$0xff]  ;;  %v4380_v60 = vld [vmem:[%s4298_s26 + $0x51] sm:$0xff] }
  0x43   : > { %853 = vmatprep.mubr.f32.mxu0 %v4168_v0  ;;  %3702 = vmatprep.subr.msk.bf16.mxu0 %vm4282_vm2, %v3700_v40  ;;  %v4344_v54 = vld [vmem:[%s4298_s26 + $0x22] sm:$0xff]  ;;  %v3656_v55 = vpack.c.bf16 %v196_v53, %v193_v52  ;;  %v4384_v61 = vld [vmem:[%s4298_s26 + $0x52] sm:$0xff] }
  0x44   : > { %3121 = vmatmul.mubr.msk.f32.gmra.mrb[2].mxu1 %vm225_vm3, %v4324_v42  ;;  %3652 = vmatprep.subr.msk.bf16.mxu1 %vm4282_vm2, %v3650_v47  ;;  %v4368_v58 = vld [vmem:[%s4298_s26 + $0x41] sm:$0xff]  ;;  %v1334_v63 = vld [vmem:[#allocation2 + $0x198] sm:$0xff]  ;;  %v1341_v3 = vld [vmem:[#allocation2 + $0x1d0] sm:$0x3f] }
  0x45   : > { %3159 = vmatmul.mubr.msk.f32.gmra.mrb[2].mxu0 %vm225_vm3, %v4327_v45  ;;  %336 = vmatprep.mubr.f32.mxu1 %v4168_v0  ;;  %v4372_v59 = vld [vmem:[%s4298_s26 + $0x42] sm:$0xff]  ;;  %v1338_v2 = vld [vmem:[#allocation2 + $0x1b8] sm:$0xff]  ;;  %v4396_v5 = vld [vmem:[%s4298_s26 + $0x10] sm:$0xff] }
  0x46   : > { %859 = vmatprep.mubr.f32.mxu0 %v4168_v0  ;;  %3705 = vmatpush1.bf16.msk.msra.mxu0 %vm4282_vm2, %v3703_v46  ;;  %v1331_v62 = vld [vmem:[#allocation2 + $0x180] sm:$0xff]  ;;  %v3720_v7 = vpack.c.bf16 %v1341_v3, %v1338_v2  ;;  %v1337_v8 = vld [vmem:[#allocation2 + $0x1b0] sm:$0xff]  ;;  %v1340_v10 = vld [vmem:[#allocation2 + $0x1c8] sm:$0x3f] }
  0x47   : > { %3655 = vmatpush3.bf16.msk.msra.mxu1 %vm4282_vm2, %v3650_v47  ;;  %3717 = vmatprep.subr.bf16.mxu0 %v3716_v50  ;;  %v4392_v4 = vld [vmem:[%s4298_s26 + $0x61] sm:$0xff]  ;;  %v3718_v6 = vpack.c.bf16 %v1334_v63, %v1331_v62  ;;  %v4404_v13 = vld [vmem:[%s4298_s26 + $0x71] sm:$0xff]  ;;  %v3723_v16 = vpack.c.bf16 %v1340_v10, %v1337_v8 }
  0x48   : > { %3122 = vmatmul.mubr.msk.f32.gmra.mrb[4].mxu1 %vm225_vm3, %v4340_v51  ;;  %3657 = vmatprep.subr.bf16.mxu1 %v3656_v55  ;;  %v1628_v11 = vld [vmem:[#allocation2 + $0x1e8] sm:$0xff]  ;;  %v1631_v12 = vld [vmem:[#allocation2 + $0x200] sm:$0xff]  ;;  %v195_v18 = vld [vmem:[#allocation2 + $0x18] sm:$0xff] }
  0x49   : > { %3160 = vmatmul.mubr.msk.f32.gmra.mrb[4].mxu0 %vm225_vm3, %v4344_v54  ;;  %342 = vmatprep.mubr.f32.mxu1 %v4168_v0  ;;  %v4408_v15 = vld [vmem:[%s4298_s26 + $0x20] sm:$0xff]  ;;  %v3736_v20 = vpack.c.bf16 %v1631_v12, %v1628_v11  ;;  %v199_v21 = vld [vmem:[#allocation2 + $0x38] sm:$0xff]  ;;  %v202_v22 = vld [vmem:[#allocation2 + $0x50] sm:$0x3f] }
  0x4a   : > { %865 = vmatprep.mubr.f32.mxu0 %v4168_v0  ;;  %v192_v17 = vld [vmem:[#allocation2] sm:$0xff]  ;;  %v4420_v23 = vld [vmem:[%s4298_s26 + $0x30] sm:$0xff]  ;;  %v3660_v26 = vpack.c.bf16 %v202_v22, %v199_v21  ;;  %v201_v28 = vld [vmem:[#allocation2 + $0x48] sm:$0x3f] }
  0x4b   : > { %v3658_v24 = vpack.c.bf16 %v195_v18, %v192_v17  ;;  %v198_v27 = vld [vmem:[#allocation2 + $0x30] sm:$0xff]  ;;  %v197_v30 = vld [vmem:[#allocation2 + $0x28] sm:$0xff]  ;;  %v4432_v31 = vld [vmem:[%s4298_s26 + $0x40] sm:$0xff] }
  0x4c   : > { %3123 = vmatmul.mubr.msk.f32.gmra.mrb[6].mxu1 %vm225_vm3, %v4356_v56  ;;  %v194_v29 = vld [vmem:[#allocation2 + $0x10] sm:$0xff]  ;;  %v3663_v32 = vpack.c.bf16 %v201_v28, %v198_v27  ;;  %v4456_v36 = vld [vmem:[%s4298_s26 + $0x60] sm:$0xff]  ;;  %v203_v38 = vld [vmem:[#allocation2 + $0x58] sm:$0x3f] }
  0x4d   : > { %3161 = vmatmul.mubr.msk.f32.gmra.mrb[6].mxu0 %vm225_vm3, %v4360_v57  ;;  %348 = vmatprep.mubr.f32.mxu1 %v4168_v0  ;;  %v4444_v34 = vld [vmem:[%s4298_s26 + $0x50] sm:$0xff]  ;;  %v200_v37 = vld [vmem:[#allocation2 + $0x40] sm:$0xff]  ;;  %v1630_v46 = vld [vmem:[#allocation2 + $0x1f8] sm:$0xff] }
  0x4e   : > { %871 = vmatprep.mubr.f32.mxu0 %v4168_v0  ;;  %v184_v39 = vld [vmem:[%s4298_s26] sm:$0xff]  ;;  %v4466_v40 = vld [vmem:[%s4298_s26 + $0x70] sm:$0xff]  ;;  %v3670_v41 = vpack.c.bf16 %v203_v38, %v200_v37  ;;  %v1634_v47 = vld [vmem:[#allocation2 + $0x218] sm:$0xff] }
  0x4f   : > { %v4474_v43 = vld [vmem:[%s4298_s26 + $0x80] sm:$0xff]  ;;  %v1637_v48 = vld [vmem:[#allocation2 + $0x230] sm:$0x3f]  ;;  %v1636_v53 = vld [vmem:[#allocation2 + $0x228] sm:$0x3f] }
  0x50   : > { %3124 = vmatmul.mubr.msk.f32.gmra.mrb[8].mxu1 %vm225_vm3, %v4368_v58  ;;  %v1627_v44 = vld [vmem:[#allocation2 + $0x1e0] sm:$0xff]  ;;  %v3740_v50 = vpack.c.bf16 %v1637_v48, %v1634_v47  ;;  %v1633_v52 = vld [vmem:[#allocation2 + $0x210] sm:$0xff]  ;;  %v1925_v55 = vld [vmem:[#allocation2 + $0x248] sm:$0xff] }
  0x51   : > { %3162 = vmatmul.mubr.msk.f32.gmra.mrb[8].mxu0 %vm225_vm3, %v4372_v59  ;;  %354 = vmatprep.mubr.f32.mxu1 %v4168_v0  ;;  %v3738_v49 = vpack.c.bf16 %v1630_v46, %v1627_v44  ;;  %v1928_v62 = vld [vmem:[#allocation2 + $0x260] sm:$0xff]  ;;  %v3743_v63 = vpack.c.bf16 %v1636_v53, %v1633_v52  ;;  %v743_v3 = vld [vmem:[#allocation2 + $0xe8] sm:$0xff]  ;;  %v1927_v8 = vld [vmem:[#allocation2 + $0x258] sm:$0xff] }
  0x52   : > { %877 = vmatprep.mubr.f32.mxu0 %v4168_v0  ;;  %v3756_v2 = vpack.c.bf16 %v1928_v62, %v1925_v55  ;;  %v1931_v11 = vld [vmem:[#allocation2 + $0x278] sm:$0xff]  ;;  %v1934_v12 = vld [vmem:[#allocation2 + $0x290] sm:$0x3f]  ;;  %v1933_v17 = vld [vmem:[#allocation2 + $0x288] sm:$0x3f] }
  0x53   : > { %v2221_v18 = vld [vmem:[#allocation2 + $0x2a8] sm:$0xff]  ;;  %v746_v22 = vld [vmem:[#allocation2 + $0x100] sm:$0xff]  ;;  %v1037_v28 = vld [vmem:[#allocation2 + $0x130] sm:$0xff] }
  0x54   : > { %3125 = vmatmul.mubr.msk.f32.gmra.mrb[10].mxu1 %vm225_vm3, %v4380_v60  ;;  %v1046_v37 = vld [vmem:[#allocation2 + $0x178] sm:$0x3f]  ;;  %v4617_v44 = vld [vmem:[%s4298_s26 + $0x82] sm:$0xff]  ;;  %v2230_v52 = vld [vmem:[#allocation2 + $0x2f0] sm:$0x3f] }
  0x55   : > { %3163 = vmatmul.mubr.msk.f32.gmra.mrb[10].mxu0 %vm225_vm3, %v4384_v61  ;;  %360 = vmatprep.mubr.f32.mxu1 %v4168_v0  ;;  %v2220_v46 = vld [vmem:[#allocation2 + $0x2a0] sm:$0xff]  ;;  %v2223_v47 = vld [vmem:[#allocation2 + $0x2b8] sm:$0xff]  ;;  %v2226_v62 = vld [vmem:[#allocation2 + $0x2d0] sm:$0xff] }
  0x56   : > { %1144 = vmatprep.mubr.f32.mxu0 %v4168_v0  ;;  %v1339_v48 = vld [vmem:[#allocation2 + $0x1c0] sm:$0xff]  ;;  %v3778_v53 = vpack.c.bf16 %v2223_v47, %v2220_v46  ;;  %v2231_v46 = vld [vmem:[#allocation2 + $0x2f8] sm:$0x3f] }
  0x57   : > { %v3317_v1 = vld [vmem:[%s4298_s26 + $0x92] sm:$0xff] }
  0x58   : > { %3126 = vmatmul.mubr.msk.f32.gmra.mrb[12].mxu1 %vm225_vm3, %v4392_v4 }
  0x59   : > { %3185 = vmatmul.mubr.msk.f32.vlgmr.msra.gmra.mrb[0].mxu0 %vm225_vm3, %v4396_v5  ;;  %366 = vmatprep.mubr.f32.mxu1 %v4168_v0 }
  0x5a   : > { %3719 = vmatpush1.bf16.msra.mxu0 %v3718_v6  ;;  %1150 = vmatprep.mubr.f32.mxu0 %v4168_v0  ;;  %v4536_v6 = vld [vmem:[%s4298_s26 + $0x81] sm:$0xff] }
  0x5b   : > { %3722 = vmatprep.subr.msk.bf16.mxu0 %vm4282_vm2, %v3720_v7  ;;  %v1924_v7 = vld [vmem:[#allocation2 + $0x240] sm:$0xff] }
  0x5c   : > { %3127 = vmatmul.mubr.msk.f32.gmra.mrb[14].mxu1 %vm225_vm3, %v4404_v13 }
  0x5d   : > { %3186 = vmatmul.mubr.msk.f32.gmra.mrb[2].mxu0 %vm225_vm3, %v4408_v15  ;;  %3464 = vmatprep.mubr.msk.f32.mxu1 %vm225_vm3, %v4310_v33  ;;  %v3666_v33 = vpack.c.bf16 %v197_v30, %v194_v29  ;;  %v1040_v29 = vld [vmem:[#allocation2 + $0x148] sm:$0xff]  ;;  %v4576_v30 = vld [vmem:[%s4298_s26 + $0x72] sm:$0xff] }
  0x5e   : > { %1156 = vmatprep.mubr.f32.mxu0 %v4168_v0  ;;  %3725 = vmatpush1.bf16.msk.msra.mxu0 %vm4282_vm2, %v3723_v16  ;;  %v1930_v16 = vld [vmem:[#allocation2 + $0x270] sm:$0xff] }
  0x5f   : > { %3737 = vmatprep.subr.bf16.mxu0 %v3736_v20  ;;  %v2224_v20 = vld [vmem:[#allocation2 + $0x2c0] sm:$0xff] }
  0x60   : > { %3465 = vmatmul.mubr.msk.f32.vlgmr.msra.gmra.mrb[16].mxu1 %vm225_vm3, %v4324_v42  ;;  %v3776_v21 = vpack.c.bf16 %v2224_v20, %v2221_v18  ;;  %v4688_v18 = vld [vmem:[%s4298_s26 + $0x90] sm:$0xff]  ;;  %v2516_v20 = vld [vmem:[#allocation2 + $0x300] sm:$0xff] }
  0x61   : > { %3187 = vmatmul.mubr.msk.f32.gmra.mrb[4].mxu0 %vm225_vm3, %v4420_v23  ;;  %3467 = vmatprep.mubr.msk.f32.mxu1 %vm225_vm3, %v4340_v51 }
  0x62   : > { %3659 = vmatpush1.bf16.msra.mxu1 %v3658_v24  ;;  %1162 = vmatprep.mubr.f32.mxu0 %v4168_v0  ;;  %v749_v24 = vld [vmem:[#allocation2 + $0x118] sm:$0x3f] }
  0x63   : > { %3662 = vmatprep.subr.msk.bf16.mxu1 %vm4282_vm2, %v3660_v26  ;;  %v4566_v26 = vld [vmem:[%s4298_s26 + $0x62] sm:$0xff]  ;;  %v3690_v27 = vpack.c.bf16 %v749_v24, %v746_v22  ;;  %v1935_v22 = vld [vmem:[#allocation2 + $0x298] sm:$0x3f] }
  0x64   : > { %3468 = vmatmul.mubr.msk.f32.gmra.mrb[18].mxu1 %vm225_vm3, %v4356_v56  ;;  %v2523_v24 = vld [vmem:[#allocation2 + $0x338] sm:$0xff] }
  0x65   : > { %3188 = vmatmul.mubr.msk.f32.gmra.mrb[6].mxu0 %vm225_vm3, %v4432_v31  ;;  %3470 = vmatprep.mubr.msk.f32.mxu1 %vm225_vm3, %v4368_v58 }
  0x66   : > { %1168 = vmatprep.mubr.f32.mxu0 %v4168_v0  ;;  %3665 = vmatpush1.bf16.msk.msra.mxu1 %vm4282_vm2, %v3663_v32  ;;  %v3706_v32 = vpack.c.bf16 %v1040_v29, %v1037_v28 }
  0x67   : > { %3667 = vmatprep.subr.bf16.mxu1 %v3666_v33 }
  0x68   : > { %3471 = vmatmul.mubr.msk.f32.gmra.mrb[20].mxu1 %vm225_vm3, %v4380_v60 }
  0x69   : > { %3189 = vmatmul.mubr.msk.f32.gmra.mrb[8].mxu0 %vm225_vm3, %v4444_v34  ;;  %3473 = vmatprep.mubr.msk.f32.mxu1 %vm225_vm3, %v4392_v4 }
  0x6a   : > { %1174 = vmatprep.mubr.f32.mxu0 %v4168_v0 }
  0x6c   : > { %3474 = vmatmul.mubr.msk.f32.gmra.mrb[22].mxu1 %vm225_vm3, %v4404_v13 }
  0x6d   : > { %3190 = vmatmul.mubr.msk.f32.gmra.mrb[10].mxu0 %vm225_vm3, %v4456_v36  ;;  %575 = vmatprep.mubr.f32.mxu1 %v4168_v0 }
  0x6e   : > { %1180 = vmatprep.mubr.f32.mxu0 %v4168_v0 }
  0x70   : > { %3139 = vmatmul.mubr.msk.f32.vlgmr.msra.gmra.mrb[0].mxu1 %vm225_vm3, %v184_v39 }
  0x71   : > { %3191 = vmatmul.mubr.msk.f32.gmra.mrb[12].mxu0 %vm225_vm3, %v4466_v40  ;;  %581 = vmatprep.mubr.f32.mxu1 %v4168_v0 }
  0x72   : > { %3669 = vmatpush3.bf16.msra.mxu1 %v3666_v33  ;;  %1186 = vmatprep.mubr.f32.mxu0 %v4168_v0  ;;  %v1043_v33 = vld [vmem:[#allocation2 + $0x160] sm:$0xff] }
  0x73   : > { %3672 = vmatprep.subr.msk.bf16.mxu1 %vm4282_vm2, %v3670_v41  ;;  %v3710_v38 = vpack.c.bf16 %v1046_v37, %v1043_v33  ;;  %v2525_v37 = vld [vmem:[#allocation2 + $0x348] sm:$0x3f] }
  0x74   : > { %3140 = vmatmul.mubr.msk.f32.gmra.mrb[2].mxu1 %vm225_vm3, %v4396_v5 }
  0x75   : > { %3192 = vmatmul.mubr.msk.f32.gmra.mrb[14].mxu0 %vm225_vm3, %v4474_v43  ;;  %587 = vmatprep.mubr.f32.mxu1 %v4168_v0 }
  0x76   : > { %1440 = vmatprep.mubr.f32.mxu0 %v4168_v0  ;;  %3675 = vmatpush3.bf16.msk.msra.mxu1 %vm4282_vm2, %v3670_v41  ;;  %v1336_v41 = vld [vmem:[#allocation2 + $0x1a8] sm:$0xff] }
  0x77   : > { %3816 = vmatprep.subr.bf16.mxu1 %v4287_v9  ;;  %v740_v9 = vld [vmem:[#allocation2 + $0xd0] sm:$0xff] }
  0x78   : > { %3141 = vmatmul.mubr.msk.f32.gmra.mrb[4].mxu1 %vm225_vm3, %v4408_v15  ;;  %v3686_v10 = vpack.c.bf16 %v743_v3, %v740_v9  ;;  %v1629_v9 = vld [vmem:[#allocation2 + $0x1f0] sm:$0xff]  ;;  %v1632_v3 = vld [vmem:[#allocation2 + $0x208] sm:$0xff] }
  0x79   : > { %3212 = vmatmul.mubr.msk.f32.vlgmr.msra.gmra.mrb[0].mxu0 %vm225_vm3, %v4324_v42  ;;  %593 = vmatprep.mubr.f32.mxu1 %v4168_v0 }
  0x7a   : > { %3739 = vmatpush1.bf16.msra.mxu0 %v3738_v49  ;;  %1446 = vmatprep.mubr.f32.mxu0 %v4168_v0  ;;  %v1342_v49 = vld [vmem:[#allocation2 + $0x1d8] sm:$0x3f] }
  0x7b   : > { %3742 = vmatprep.subr.msk.bf16.mxu0 %vm4282_vm2, %v3740_v50  ;;  %v2227_v50 = vld [vmem:[#allocation2 + $0x2d8] sm:$0xff]  ;;  %v3730_v55 = vpack.c.bf16 %v1342_v49, %v1339_v48  ;;  %v2518_v48 = vld [vmem:[#allocation2 + $0x310] sm:$0xff]  ;;  %v2521_v49 = vld [vmem:[#allocation2 + $0x328] sm:$0xff] }
  0x7c   : > { %3142 = vmatmul.mubr.msk.f32.gmra.mrb[6].mxu1 %vm225_vm3, %v4420_v23 }
  0x7d   : > { %3213 = vmatmul.mubr.msk.f32.gmra.mrb[2].mxu0 %vm225_vm3, %v4340_v51  ;;  %599 = vmatprep.mubr.f32.mxu1 %v4168_v0 }
  0x7e   : > { %1452 = vmatprep.mubr.f32.mxu0 %v4168_v0  ;;  %3745 = vmatpush1.bf16.msk.msra.mxu0 %vm4282_vm2, %v3743_v63  ;;  %v3780_v63 = vpack.c.bf16 %v2230_v52, %v2227_v50  ;;  %v4831_v50 = vld [vmem:[%s4965_s2] ss:$0 sm:$0xff] }
  0x7f   : > { %3757 = vmatprep.subr.bf16.mxu0 %v3756_v2  ;;  %v2229_v2 = vld [vmem:[#allocation2 + $0x2e8] sm:$0x3f] }
  0x80   : > { %3143 = vmatmul.mubr.msk.f32.gmra.mrb[8].mxu1 %vm225_vm3, %v4432_v31 }
  0x81   : > { %3214 = vmatmul.mubr.msk.f32.gmra.mrb[4].mxu0 %vm225_vm3, %v4356_v56  ;;  %605 = vmatprep.mubr.f32.mxu1 %v4168_v0 }
  0x82   : > { %1458 = vmatprep.mubr.f32.mxu0 %v4168_v0 }
  0x84   : > { %3144 = vmatmul.mubr.msk.f32.gmra.mrb[10].mxu1 %vm225_vm3, %v4444_v34 }
  0x85   : > { %3215 = vmatmul.mubr.msk.f32.gmra.mrb[6].mxu0 %vm225_vm3, %v4368_v58  ;;  %611 = vmatprep.mubr.f32.mxu1 %v4168_v0 }
  0x86   : > { %1464 = vmatprep.mubr.f32.mxu0 %v4168_v0 }
  0x88   : > { %3145 = vmatmul.mubr.msk.f32.gmra.mrb[12].mxu1 %vm225_vm3, %v4456_v36 }
  0x89   : > { %3216 = vmatmul.mubr.msk.f32.gmra.mrb[8].mxu0 %vm225_vm3, %v4380_v60  ;;  %617 = vmatprep.mubr.f32.mxu1 %v4168_v0 }
  0x8a   : > { %1470 = vmatprep.mubr.f32.mxu0 %v4168_v0 }
  0x8c   : > { %3146 = vmatmul.mubr.msk.f32.gmra.mrb[14].mxu1 %vm225_vm3, %v4466_v40 }
  0x8d   : > { %3217 = vmatmul.mubr.msk.f32.gmra.mrb[10].mxu0 %vm225_vm3, %v4392_v4  ;;  %3484 = vmatprep.mubr.msk.f32.mxu1 %vm225_vm3, %v184_v39  ;;  %v1333_v39 = vld [vmem:[#allocation2 + $0x190] sm:$0xff] }
  0x8e   : > { %1476 = vmatprep.mubr.f32.mxu0 %v4168_v0 }
  0x90   : > { %3485 = vmatmul.mubr.msk.f32.vlgmr.msra.gmra.mrb[16].mxu1 %vm225_vm3, %v4396_v5 }
  0x91   : > { %3218 = vmatmul.mubr.msk.f32.gmra.mrb[12].mxu0 %vm225_vm3, %v4404_v13  ;;  %3487 = vmatprep.mubr.msk.f32.mxu1 %vm225_vm3, %v4408_v15 }
  0x92   : > { %3818 = vmatpush1.bf16.msra.mxu1 %v4289_v14  ;;  %1482 = vmatprep.mubr.f32.mxu0 %v4168_v0  ;;  %v3758_v14 = vpack.c.bf16 %v1927_v8, %v1924_v7  ;;  %v2520_v7 = vld [vmem:[#allocation2 + $0x320] sm:$0xff]  ;;  %v3783_v8 = vpack.c.bf16 %v2229_v2, %v2226_v62 }
  0x93   : > { %3817 = vmatprep.subr.msk.bf16.mxu1 %vm4282_vm2, %v4292_v19  ;;  %v3760_v19 = vpack.c.bf16 %v1934_v12, %v1931_v11  ;;  %v1635_v12 = vld [vmem:[#allocation2 + $0x220] sm:$0xff] }
  0x94   : > { %3488 = vmatmul.mubr.msk.f32.gmra.mrb[18].mxu1 %vm225_vm3, %v4420_v23 }
  0x95   : > { %3219 = vmatmul.mubr.msk.f32.gmra.mrb[14].mxu0 %vm225_vm3, %v4536_v6  ;;  %3490 = vmatprep.mubr.msk.f32.mxu1 %vm225_vm3, %v4432_v31 }
  0x96   : > { %1736 = vmatprep.mubr.f32.mxu0 %v4168_v0  ;;  %3819 = vmatpush1.bf16.msk.msra.mxu1 %vm4282_vm2, %v4305_v25  ;;  %v3763_v25 = vpack.c.bf16 %v1933_v17, %v1930_v16  ;;  %v1926_v16 = vld [vmem:[#allocation2 + $0x250] sm:$0xff]  ;;  %v1929_v17 = vld [vmem:[#allocation2 + $0x268] sm:$0xff] }
  0x97   : > { %3687 = vmatprep.subr.bf16.mxu1 %v3686_v10 }
  0x98   : > { %3491 = vmatmul.mubr.msk.f32.gmra.mrb[20].mxu1 %vm225_vm3, %v4444_v34 }
  0x99   : > { %3239 = vmatmul.mubr.msk.f32.vlgmr.msra.gmra.mrb[0].mxu0 %vm225_vm3, %v4327_v45  ;;  %3493 = vmatprep.mubr.msk.f32.mxu1 %vm225_vm3, %v4456_v36 }
  0x9a   : > { %3759 = vmatpush1.bf16.msra.mxu0 %v3758_v14  ;;  %1742 = vmatprep.mubr.f32.mxu0 %v4168_v0  ;;  %v1638_v14 = vld [vmem:[#allocation2 + $0x238] sm:$0x3f] }
  0x9b   : > { %3762 = vmatprep.subr.msk.bf16.mxu0 %vm4282_vm2, %v3760_v19  ;;  %v3750_v19 = vpack.c.bf16 %v1638_v14, %v1635_v12 }
  0x9c   : > { %3494 = vmatmul.mubr.msk.f32.gmra.mrb[22].mxu1 %vm225_vm3, %v4466_v40 }
  0x9d   : > { %3240 = vmatmul.mubr.msk.f32.gmra.mrb[2].mxu0 %vm225_vm3, %v4344_v54  ;;  %883 = vmatprep.mubr.f32.mxu1 %v4168_v0 }
  0x9e   : > { %1748 = vmatprep.mubr.f32.mxu0 %v4168_v0  ;;  %3765 = vmatpush1.bf16.msk.msra.mxu0 %vm4282_vm2, %v3763_v25  ;;  %v2519_v25 = vld [vmem:[#allocation2 + $0x318] sm:$0xff] }
  0x9f   : > { %3777 = vmatprep.subr.bf16.mxu0 %v3776_v21  ;;  %v1932_v21 = vld [vmem:[#allocation2 + $0x280] sm:$0xff]  ;;  %v3798_v28 = vpack.c.bf16 %v2519_v25, %v2516_v20 }
  0xa0   : > { %3164 = vmatmul.mubr.msk.f32.vlgmr.msra.gmra.mrb[12].mxu1 %vm225_vm3, %v4566_v26  ;;  %v3770_v29 = vpack.c.bf16 %v1935_v22, %v1932_v21  ;;  %v4847_v22 = vld [vmem:[%s4965_s2 + $0x2] ss:$0 sm:$0xff] }
  0xa1   : > { %3241 = vmatmul.mubr.msk.f32.gmra.mrb[4].mxu0 %vm225_vm3, %v4360_v57  ;;  %3689 = vmatpush3.bf16.msra.mxu1 %v3686_v10  ;;  %v3746_v10 = vpack.c.bf16 %v1632_v3, %v1629_v9 }
  0xa2   : > { %889 = vmatprep.mubr.f32.mxu1 %v4168_v0  ;;  %1754 = vmatprep.mubr.f32.mxu0 %v4168_v0 }
  0xa3   : > { %3692 = vmatprep.subr.msk.bf16.mxu1 %vm4282_vm2, %v3690_v27 }
  0xa4   : > { %3165 = vmatmul.mubr.msk.f32.gmra.mrb[14].mxu1 %vm225_vm3, %v4576_v30 }
  0xa5   : > { %3242 = vmatmul.mubr.msk.f32.gmra.mrb[6].mxu0 %vm225_vm3, %v4372_v59  ;;  %3695 = vmatpush3.bf16.msk.msra.mxu1 %vm4282_vm2, %v3690_v27  ;;  %v2526_v27 = vld [vmem:[#allocation2 + $0x350] sm:$0x3f] }
  0xa6   : > { %3504 = vmatprep.mubr.msk.f32.mxu1 %vm225_vm3, %v4316_v35  ;;  %1760 = vmatprep.mubr.f32.mxu0 %v4168_v0  ;;  %v3726_v35 = vpack.c.bf16 %v1336_v41, %v1333_v39  ;;  %v3800_v33 = vpack.c.bf16 %v2526_v27, %v2523_v24  ;;  %v2225_v39 = vld [vmem:[#allocation2 + $0x2c8] sm:$0xff] }
  0xa7   : > { %3707 = vmatprep.subr.bf16.mxu1 %v3706_v32 }
  0xa8   : > { %3505 = vmatmul.mubr.msk.f32.vlgmr.msra.gmra.mrb[16].mxu1 %vm225_vm3, %v4327_v45 }
  0xa9   : > { %3243 = vmatmul.mubr.msk.f32.gmra.mrb[8].mxu0 %vm225_vm3, %v4384_v61  ;;  %3507 = vmatprep.mubr.msk.f32.mxu1 %vm225_vm3, %v4344_v54 }
  0xaa   : > { %3709 = vmatpush3.bf16.msra.mxu1 %v3706_v32  ;;  %1766 = vmatprep.mubr.f32.mxu0 %v4168_v0  ;;  %v2522_v32 = vld [vmem:[#allocation2 + $0x330] sm:$0xff] }
  0xab   : > { %3712 = vmatprep.subr.msk.bf16.mxu1 %vm4282_vm2, %v3710_v38 }
  0xac   : > { %3508 = vmatmul.mubr.msk.f32.gmra.mrb[18].mxu1 %vm225_vm3, %v4360_v57 }
  0xad   : > { %3244 = vmatmul.mubr.msk.f32.gmra.mrb[10].mxu0 %vm225_vm3, %v4566_v26  ;;  %3510 = vmatprep.mubr.msk.f32.mxu1 %vm225_vm3, %v4372_v59 }
  0xae   : > { %1772 = vmatprep.mubr.f32.mxu0 %v4168_v0  ;;  %3715 = vmatpush3.bf16.msk.msra.mxu1 %vm4282_vm2, %v3710_v38  ;;  %v2222_v38 = vld [vmem:[#allocation2 + $0x2b0] sm:$0xff] }
  0xaf   : > { %3727 = vmatprep.subr.bf16.mxu1 %v3726_v35  ;;  %v3786_v41 = vpack.c.bf16 %v2225_v39, %v2222_v38 }
  0xb0   : > { %3511 = vmatmul.mubr.msk.f32.gmra.mrb[20].mxu1 %vm225_vm3, %v4384_v61 }
  0xb1   : > { %3245 = vmatmul.mubr.msk.f32.gmra.mrb[12].mxu0 %vm225_vm3, %v4576_v30  ;;  %3513 = vmatprep.mubr.msk.f32.mxu1 %vm225_vm3, %v4566_v26 }
  0xb2   : > { %1778 = vmatprep.mubr.f32.mxu0 %v4168_v0 }
  0xb4   : > { %3514 = vmatmul.mubr.msk.f32.gmra.mrb[22].mxu1 %vm225_vm3, %v4576_v30 }
  0xb5   : > { %3246 = vmatmul.mubr.msk.f32.gmra.mrb[14].mxu0 %vm225_vm3, %v4617_v44  ;;  %3524 = vmatprep.mubr.msk.f32.mxu1 %vm225_vm3, %v4396_v5  ;;  %v2517_v5 = vld [vmem:[#allocation2 + $0x308] sm:$0xff] }
  0xb6   : > { %2033 = vmatprep.mubr.f32.mxu0 %v4168_v0  ;;  %v3796_v11 = vpack.c.bf16 %v2520_v7, %v2517_v5 }
  0xb8   : > { %3525 = vmatmul.mubr.msk.f32.vlgmr.msra.gmra.mrb[16].mxu1 %vm225_vm3, %v4408_v15 }
  0xb9   : > { %3266 = vmatmul.mubr.msk.f32.vlgmr.msra.gmra.mrb[0].mxu0 %vm225_vm3, %v4408_v15  ;;  %3527 = vmatprep.mubr.msk.f32.mxu1 %vm225_vm3, %v4420_v23 }
  0xba   : > { %3779 = vmatpush1.bf16.msra.mxu0 %v3778_v53  ;;  %3729 = vmatpush3.bf16.msra.mxu1 %v3726_v35  ;;  %v2228_v35 = vld [vmem:[#allocation2 + $0x2e0] sm:$0xff] }
  0xbb   : > { %2039 = vmatprep.mubr.f32.mxu0 %v4168_v0  ;;  %3732 = vmatprep.subr.msk.bf16.mxu1 %vm4282_vm2, %v3730_v55  ;;  %v3790_v47 = vpack.c.bf16 %v2231_v46, %v2228_v35 }
  0xbc   : > { %3528 = vmatmul.mubr.msk.f32.gmra.mrb[18].mxu1 %vm225_vm3, %v4432_v31  ;;  %3782 = vmatprep.subr.msk.bf16.mxu0 %vm4282_vm2, %v3780_v63 }
  0xbd   : > { %3267 = vmatmul.mubr.msk.f32.gmra.mrb[2].mxu0 %vm225_vm3, %v4420_v23  ;;  %3530 = vmatprep.mubr.msk.f32.mxu1 %vm225_vm3, %v4444_v34 }
  0xbe   : > { %2045 = vmatprep.mubr.f32.mxu0 %v4168_v0  ;;  %3735 = vmatpush3.bf16.msk.msra.mxu1 %vm4282_vm2, %v3730_v55  ;;  %v4836_v55 = vld [vmem:[%s4965_s2 + $0x1] ss:$0 sm:$0xff] }
  0xbf   : > { %3785 = vmatpush1.bf16.msk.msra.mxu0 %vm4282_vm2, %v3783_v8  ;;  %3747 = vmatprep.subr.bf16.mxu1 %v3746_v10 }
  0xc0   : > { %3531 = vmatmul.mubr.msk.f32.gmra.mrb[20].mxu1 %vm225_vm3, %v4456_v36  ;;  %3797 = vmatprep.subr.bf16.mxu0 %v3796_v11 }
  0xc1   : > { %3268 = vmatmul.mubr.msk.f32.gmra.mrb[4].mxu0 %vm225_vm3, %v4432_v31  ;;  %3533 = vmatprep.mubr.msk.f32.mxu1 %vm225_vm3, %v4466_v40 }
  0xc2   : > { %2051 = vmatprep.mubr.f32.mxu0 %v4168_v0 }
  0xc4   : > { %3534 = vmatmul.mubr.msk.f32.gmra.mrb[22].mxu1 %vm225_vm3, %v4474_v43 }
  0xc5   : > { %3269 = vmatmul.mubr.msk.f32.gmra.mrb[6].mxu0 %vm225_vm3, %v4444_v34  ;;  %3544 = vmatprep.mubr.msk.f32.mxu1 %vm225_vm3, %v4324_v42  ;;  %v3766_v42 = vpack.c.bf16 %v1929_v17, %v1926_v16 }
  0xc6   : > { %2057 = vmatprep.mubr.f32.mxu0 %v4168_v0 }
  0xc8   : > { %3545 = vmatmul.mubr.msk.f32.vlgmr.msra.gmra.mrb[16].mxu1 %vm225_vm3, %v4340_v51 }
  0xc9   : > { %3270 = vmatmul.mubr.msk.f32.gmra.mrb[8].mxu0 %vm225_vm3, %v4456_v36  ;;  %3547 = vmatprep.mubr.msk.f32.mxu1 %vm225_vm3, %v4356_v56 }
  0xca   : > { %3749 = vmatpush3.bf16.msra.mxu1 %v3746_v10  ;;  %2063 = vmatprep.mubr.f32.mxu0 %v4168_v0 }
  0xcb   : > { %3752 = vmatprep.subr.msk.bf16.mxu1 %vm4282_vm2, %v3750_v19 }
  0xcc   : > { %3548 = vmatmul.mubr.msk.f32.gmra.mrb[18].mxu1 %vm225_vm3, %v4368_v58 }
  0xcd   : > { %3271 = vmatmul.mubr.msk.f32.gmra.mrb[10].mxu0 %vm225_vm3, %v4466_v40  ;;  %3550 = vmatprep.mubr.msk.f32.mxu1 %vm225_vm3, %v4380_v60 }
  0xce   : > { %2069 = vmatprep.mubr.f32.mxu0 %v4168_v0  ;;  %3755 = vmatpush3.bf16.msk.msra.mxu1 %vm4282_vm2, %v3750_v19 }
  0xcf   : > { %3767 = vmatprep.subr.bf16.mxu1 %v3766_v42 }
  0xd0   : > { %3551 = vmatmul.mubr.msk.f32.gmra.mrb[20].mxu1 %vm225_vm3, %v4392_v4 }
  0xd1   : > { %3272 = vmatmul.mubr.msk.f32.gmra.mrb[12].mxu0 %vm225_vm3, %v4474_v43  ;;  %3553 = vmatprep.mubr.msk.f32.mxu1 %vm225_vm3, %v4404_v13 }
  0xd2   : > { %2075 = vmatprep.mubr.f32.mxu0 %v4168_v0 }
  0xd4   : > { %3554 = vmatmul.mubr.msk.f32.gmra.mrb[22].mxu1 %vm225_vm3, %v4536_v6 }
  0xd5   : > { %3273 = vmatmul.mubr.msk.f32.gmra.mrb[14].mxu0 %vm225_vm3, %v4688_v18  ;;  %3564 = vmatprep.mubr.msk.f32.mxu1 %vm225_vm3, %v4327_v45  ;;  %v3803_v45 = vpack.c.bf16 %v2525_v37, %v2522_v32 }
  0xd6   : > { %2329 = vmatprep.mubr.f32.mxu0 %v4168_v0 }
  0xd8   : > { %3565 = vmatmul.mubr.msk.f32.vlgmr.msra.gmra.mrb[16].mxu1 %vm225_vm3, %v4344_v54 }
  0xd9   : > { %3293 = vmatmul.mubr.msk.f32.vlgmr.msra.gmra.mrb[0].mxu0 %vm225_vm3, %v4340_v51  ;;  %3567 = vmatprep.mubr.msk.f32.mxu1 %vm225_vm3, %v4360_v57 }
  0xda   : > { %3799 = vmatpush1.bf16.msra.mxu0 %v3798_v28  ;;  %3769 = vmatpush3.bf16.msra.mxu1 %v3766_v42 }
  0xdb   : > { %2335 = vmatprep.mubr.f32.mxu0 %v4168_v0  ;;  %3772 = vmatprep.subr.msk.bf16.mxu1 %vm4282_vm2, %v3770_v29 }
  0xdc   : > { %3568 = vmatmul.mubr.msk.f32.gmra.mrb[18].mxu1 %vm225_vm3, %v4372_v59  ;;  %3802 = vmatprep.subr.msk.bf16.mxu0 %vm4282_vm2, %v3800_v33 }
  0xdd   : > { %3294 = vmatmul.mubr.msk.f32.gmra.mrb[2].mxu0 %vm225_vm3, %v4356_v56  ;;  %3570 = vmatprep.mubr.msk.f32.mxu1 %vm225_vm3, %v4384_v61 }
  0xde   : > { %2341 = vmatprep.mubr.f32.mxu0 %v4168_v0  ;;  %3775 = vmatpush3.bf16.msk.msra.mxu1 %vm4282_vm2, %v3770_v29 }
  0xdf   : > { %3805 = vmatpush1.bf16.msk.msra.mxu0 %vm4282_vm2, %v3803_v45  ;;  %3787 = vmatprep.subr.bf16.mxu1 %v3786_v41 }
  0xe0   : > { %3571 = vmatmul.mubr.msk.f32.gmra.mrb[20].mxu1 %vm225_vm3, %v4566_v26 }
  0xe1   : > { %3295 = vmatmul.mubr.msk.f32.gmra.mrb[4].mxu0 %vm225_vm3, %v4368_v58  ;;  %3573 = vmatprep.mubr.msk.f32.mxu1 %vm225_vm3, %v4576_v30 }
  0xe2   : > { %2347 = vmatprep.mubr.f32.mxu0 %v4168_v0 }
  0xe4   : > { %3574 = vmatmul.mubr.msk.f32.gmra.mrb[22].mxu1 %vm225_vm3, %v4617_v44 }
  0xe5   : > { %3296 = vmatmul.mubr.msk.f32.gmra.mrb[6].mxu0 %vm225_vm3, %v4380_v60  ;;  %3584 = vmatprep.mubr.msk.f32.mxu1 %vm225_vm3, %v4408_v15  ;;  %v3806_v15 = vpack.c.bf16 %v2521_v49, %v2518_v48 }
  0xe6   : > { %2353 = vmatprep.mubr.f32.mxu0 %v4168_v0 }
  0xe8   : > { %3585 = vmatmul.mubr.msk.f32.vlgmr.msra.gmra.mrb[16].mxu1 %vm225_vm3, %v4420_v23  ;;  %v3290_v23 = vld [vmem:[%s4298_s26 + $0x91] sm:$0xff]  ;;  %s4103_s26 = scalar_lea.vmem %s4102_s25, 512 }
  0xe9   : > { %3297 = vmatmul.mubr.msk.f32.gmra.mrb[8].mxu0 %vm225_vm3, %v4392_v4  ;;  %3587 = vmatprep.mubr.msk.f32.mxu1 %vm225_vm3, %v4432_v31  ;;  %v2524_v31 = vld [vmem:[#allocation2 + $0x340] sm:$0xff]  ;;  %p4105_p3 = scmp.lt.s32.totalorder %s4103_s26, %s4097_s20 }
  0xea   : > { %2359 = vmatprep.mubr.f32.mxu0 %v4168_v0  ;;  %3789 = vmatpush3.bf16.msra.mxu1 %v3786_v41 }
  0xeb   : > { %3792 = vmatprep.subr.msk.bf16.mxu1 %vm4282_vm2, %v3790_v47  ;;  %p4106_p4 = por %p4105_p3, %p4104_p2 }
  0xec   : > { %3588 = vmatmul.mubr.msk.f32.gmra.mrb[18].mxu1 %vm225_vm3, %v4444_v34  ;;  %v2527_v34 = vld [vmem:[#allocation2 + $0x358] sm:$0x3f] }
  0xed   : > { %3298 = vmatmul.mubr.msk.f32.gmra.mrb[10].mxu0 %vm225_vm3, %v4404_v13  ;;  %3590 = vmatprep.mubr.msk.f32.mxu1 %vm225_vm3, %v4456_v36  ;;  %v3810_v36 = vpack.c.bf16 %v2527_v34, %v2524_v31  ;;  %p4107_p7 = pnand %p4106_p4, %p4100_p12 }
  0xee   : > { %2365 = vmatprep.mubr.f32.mxu0 %v4168_v0  ;;  %3795 = vmatpush3.bf16.msk.msra.mxu1 %vm4282_vm2, %v3790_v47 }
  0xef   : > { %3807 = vmatprep.subr.bf16.mxu1 %v3806_v15 }
  0xf0   : > { %3591 = vmatmul.mubr.msk.f32.gmra.mrb[20].mxu1 %vm225_vm3, %v4466_v40 }
  0xf1   : > { %3299 = vmatmul.mubr.msk.f32.gmra.mrb[12].mxu0 %vm225_vm3, %v4536_v6  ;;  %3593 = vmatprep.mubr.msk.f32.mxu1 %vm225_vm3, %v4474_v43 }
  0xf2   : > { %2371 = vmatprep.mubr.f32.mxu0 %v4168_v0 }
  0xf4   : > { %3594 = vmatmul.mubr.msk.f32.gmra.mrb[22].mxu1 %vm225_vm3, %v4688_v18 }
  0xf5   : > { %3300 = vmatmul.mubr.msk.f32.gmra.mrb[14].mxu0 %vm225_vm3, %v3290_v23  ;;  %3604 = vmatprep.mubr.msk.f32.mxu1 %vm225_vm3, %v4340_v51 }
  0xf6   : > { %2625 = vmatprep.mubr.f32.mxu0 %v4168_v0 }
  0xf8   : > { %3605 = vmatmul.mubr.msk.f32.vlgmr.msra.gmra.mrb[16].mxu1 %vm225_vm3, %v4356_v56 }
  0xf9   : > { %3320 = vmatmul.mubr.msk.f32.vlgmr.msra.gmra.mrb[0].mxu0 %vm225_vm3, %v4344_v54  ;;  %3607 = vmatprep.mubr.msk.f32.mxu1 %vm225_vm3, %v4368_v58 }
  0xfa   : > { %2631 = vmatprep.mubr.f32.mxu0 %v4168_v0  ;;  %3809 = vmatpush3.bf16.msra.mxu1 %v3806_v15 }
  0xfb   : > { %3812 = vmatprep.subr.msk.bf16.mxu1 %vm4282_vm2, %v3810_v36 }
  0xfc   : > { %3608 = vmatmul.mubr.msk.f32.gmra.mrb[18].mxu1 %vm225_vm3, %v4380_v60 }
  0xfd   : > { %3321 = vmatmul.mubr.msk.f32.gmra.mrb[2].mxu0 %vm225_vm3, %v4360_v57  ;;  %3610 = vmatprep.mubr.msk.f32.mxu1 %vm225_vm3, %v4392_v4 }
  0xfe   : > { %2637 = vmatprep.mubr.f32.mxu0 %v4168_v0  ;;  %3815 = vmatpush3.bf16.msk.msra.mxu1 %vm4282_vm2, %v3810_v36 }
 0x100   : > { %3611 = vmatmul.mubr.msk.f32.gmra.mrb[20].mxu1 %vm225_vm3, %v4404_v13 }
 0x101   : > { %3322 = vmatmul.mubr.msk.f32.gmra.mrb[4].mxu0 %vm225_vm3, %v4372_v59  ;;  %3613 = vmatprep.mubr.msk.f32.mxu1 %vm225_vm3, %v4536_v6 }
 0x102   : > { %2643 = vmatprep.mubr.f32.mxu0 %v4168_v0 }
 0x104   : > { %3614 = vmatmul.mubr.msk.f32.gmra.mrb[22].mxu1 %vm225_vm3, %v3290_v23 }
 0x105   : > { %3323 = vmatmul.mubr.msk.f32.gmra.mrb[6].mxu0 %vm225_vm3, %v4384_v61  ;;  %3624 = vmatprep.mubr.msk.f32.mxu1 %vm225_vm3, %v4344_v54 }
 0x106   : > { %2649 = vmatprep.mubr.f32.mxu0 %v4168_v0 }
 0x108   : > { %3625 = vmatmul.mubr.msk.f32.vlgmr.msra.gmra.mrb[16].mxu1 %vm225_vm3, %v4360_v57 }
 0x109   : > { %3324 = vmatmul.mubr.msk.f32.gmra.mrb[8].mxu0 %vm225_vm3, %v4566_v26  ;;  %3627 = vmatprep.mubr.msk.f32.mxu1 %vm225_vm3, %v4372_v59 }
 0x10a   : > { %2655 = vmatprep.mubr.f32.mxu0 %v4168_v0 }
 0x10c   : > { %3628 = vmatmul.mubr.msk.f32.gmra.mrb[18].mxu1 %vm225_vm3, %v4384_v61 }
 0x10d   : > { %3325 = vmatmul.mubr.msk.f32.gmra.mrb[10].mxu0 %vm225_vm3, %v4576_v30  ;;  %3630 = vmatprep.mubr.msk.f32.mxu1 %vm225_vm3, %v4566_v26 }
 0x10e   : > { %2661 = vmatprep.mubr.f32.mxu0 %v4168_v0 }
 0x110   : > { %3631 = vmatmul.mubr.msk.f32.gmra.mrb[20].mxu1 %vm225_vm3, %v4576_v30 }
 0x111   : > { %3326 = vmatmul.mubr.msk.f32.gmra.mrb[12].mxu0 %vm225_vm3, %v4617_v44  ;;  %3633 = vmatprep.mubr.msk.f32.mxu1 %vm225_vm3, %v4617_v44 }
 0x112   : > { %2667 = vmatprep.mubr.f32.mxu0 %v4168_v0 }
 0x114   : > { %3634 = vmatmul.mubr.msk.f32.gmra.mrb[22].mxu1 %vm225_vm3, %v3317_v1 }
 0x115   : > { %3327 = vmatmul.mubr.msk.f32.gmra.mrb[14].mxu0 %vm225_vm3, %v3317_v1 }
 0x143   : > { %v577_v51 = vpop.f32.mrb[0].mxu1 }
 0x144   : > { %v579_v54 = vpop.f32.mrb[1].mxu1 }
 0x147   : > { %v583_v56 = vpop.f32.mrb[2].mxu1 }
 0x148   : > { %v585_v57 = vpop.f32.mrb[3].mxu1 }
 0x14b   : > { %v589_v58 = vpop.f32.mrb[4].mxu1 }
 0x14c   : > { %v591_v59 = vpop.f32.mrb[5].mxu1 }
 0x14f   : > { %v595_v60 = vpop.f32.mrb[6].mxu1 }
 0x150   : > { %v597_v61 = vpop.f32.mrb[7].mxu1 }
 0x153   : > { %v601_v4 = vpop.f32.mrb[8].mxu1 }
 0x154   : > { %v603_v13 = vpop.f32.mrb[9].mxu1 }
 0x157   : > { %v607_v40 = vpop.f32.mrb[10].mxu1 }
 0x158   : > { %v609_v43 = vpop.f32.mrb[11].mxu1 }
 0x173   : > { %v4820_v6 = vpop.f32.mrb[12].mxu1 }
 0x174   : > { %v4822_v26 = vpop.f32.mrb[13].mxu1 }
 0x177   : > { %v4824_v0 = vpop.f32.mrb[14].mxu1 }
 0x178   : > { %v4826_v30 = vpop.f32.mrb[15].mxu1 }
 0x1cc   : > { %v2627_v44 = vpop.f32.mrb[0].mxu0 }
 0x1cd   : > { %v3820_v52 = vadd.f32 %v2627_v44, %v577_v51  ;;  %v2629_v53 = vpop.f32.mrb[1].mxu0 }
 0x1ce   : > { %v3821_v62 = vadd.f32 %v2629_v53, %v579_v54 }
 0x1cf   : > { %v2810_v63 = vadd.f32 %v3820_v52, %v4831_v50 }
 0x1d0   : > { %v2826_v2 = vadd.f32 %v3821_v62, %v4836_v55  ;;  %v2633_v9 = vpop.f32.mrb[2].mxu0 }
 0x1d1   : > { %v3822_v3 = vadd.f32 %v2633_v9, %v583_v56  ;;  %v2635_v5 = vpop.f32.mrb[3].mxu0 }
 0x1d2   : > { %v3823_v7 = vadd.f32 %v2635_v5, %v585_v57  ;;  %v2834_v8 = vmax.f32 %v2810_v63, %v2826_v2 }
 0x1d3   : > { %v2811_v10 = vadd.f32 %v3822_v3, %v4831_v50 }
 0x1d4   : > { %v2827_v11 = vadd.f32 %v3823_v7, %v4836_v55  ;;  %v2639_v12 = vpop.f32.mrb[4].mxu0 }
 0x1d5   : > { %v3824_v14 = vadd.f32 %v2639_v12, %v589_v58  ;;  %v2641_v19 = vpop.f32.mrb[5].mxu0 }
 0x1d6   : > { %v3825_v16 = vadd.f32 %v2641_v19, %v591_v59  ;;  %v2835_v17 = vmax.f32 %v2811_v10, %v2827_v11 }
 0x1d7   : > { %v2812_v42 = vadd.f32 %v3824_v14, %v4831_v50 }
 0x1d8   : > { %v2828_v18 = vadd.f32 %v3825_v16, %v4836_v55  ;;  %v2645_v20 = vpop.f32.mrb[6].mxu0 }
 0x1d9   : > { %v3826_v25 = vadd.f32 %v2645_v20, %v595_v60  ;;  %v2647_v21 = vpop.f32.mrb[7].mxu0 }
 0x1da   : > { %v3827_v24 = vadd.f32 %v2647_v21, %v597_v61  ;;  %v2836_v27 = vmax.f32 %v2812_v42, %v2828_v18 }
 0x1db   : > { %v2813_v28 = vadd.f32 %v3826_v25, %v4831_v50  ;;  %v3626_v29 = vpop.f32.mrb[16].mxu1 }
 0x1dc   : > { %v2829_v32 = vadd.f32 %v3827_v24, %v4836_v55  ;;  %v2651_v33 = vpop.f32.mrb[8].mxu0  ;;  %v2851_v37 = vadd.f32 %v3626_v29, %v4847_v22  ;;  %v2740_v38 = vpop.f32.mrb[17].mxu1 }
 0x1dd   : > { %v3828_v39 = vadd.f32 %v2651_v33, %v601_v4  ;;  %v2653_v45 = vpop.f32.mrb[9].mxu0  ;;  %v2850_v41 = vadd.f32 %v4847_v22, %v2740_v38 }
 0x1de   : > { %v2859_v35 = vmax.f32 %v2835_v17, %v2851_v37  ;;  %v3829_v46 = vadd.f32 %v2653_v45, %v603_v13  ;;  %v2837_v47 = vmax.f32 %v2813_v28, %v2829_v32 }
 0x1df   : > { %v4855_v48 = vadd.f32 %v3828_v39, %v4831_v50  ;;  %v2858_v49 = vmax.f32 %v2834_v8, %v2850_v41  ;;  %v3629_v15 = vpop.f32.mrb[18].mxu1 }
 0x1e0   : > { %v2875_v23 = vrot.slane %v2859_v35, 1  ;;  %v4858_v31 = vadd.f32 %v3829_v46, %v4836_v55  ;;  %v2657_v34 = vpop.f32.mrb[10].mxu0  ;;  %v2853_v36 = vadd.f32 %v3629_v15, %v4847_v22  ;;  %v2750_v1 = vpop.f32.mrb[19].mxu1  ;;  %v2899_v51 = vrot.slane %v2859_v35, 2 }
 0x1e1   : > { %v2874_v54 = vrot.slane %v2858_v49, 1  ;;  %v3830_v56 = vadd.f32 %v2657_v34, %v607_v40  ;;  %v2659_v57 = vpop.f32.mrb[11].mxu0  ;;  %v2852_v58 = vadd.f32 %v4847_v22, %v2750_v1  ;;  %v2898_v44 = vrot.slane %v2858_v49, 2 }
 0x1e2   : > { %v2891_v59 = vmax.f32 %v2859_v35, %v2875_v23  ;;  %v2861_v60 = vmax.f32 %v2837_v47, %v2853_v36  ;;  %v3831_v61 = vadd.f32 %v2659_v57, %v609_v43  ;;  %v2838_v4 = vmax.f32 %v4855_v48, %v4858_v31 }
 0x1e3   : > { %v2890_v13 = vmax.f32 %v2858_v49, %v2874_v54  ;;  %v2815_v52 = vadd.f32 %v3830_v56, %v4831_v50  ;;  %v2860_v53 = vmax.f32 %v2836_v27, %v2852_v58  ;;  %v3632_v62 = vpop.f32.mrb[20].mxu1 }
 0x1e4   : > { %v2915_v63 = vmax.f32 %v2891_v59, %v2899_v51  ;;  %v2877_v2 = vrot.slane %v2861_v60, 1  ;;  %v2901_v9 = vrot.slane %v2861_v60, 2  ;;  %v2831_v40 = vadd.f32 %v3831_v61, %v4836_v55  ;;  %v2663_v3 = vpop.f32.mrb[12].mxu0  ;;  %v2760_v5 = vpop.f32.mrb[21].mxu1 }
 0x1e5   : > { %v2914_v7 = vmax.f32 %v2890_v13, %v2898_v44  ;;  %v2978_v8 = vmax.f32 %v2890_v13, %v2891_v59  ;;  %v2876_v43 = vrot.slane %v2860_v53, 1  ;;  %v2900_v10 = vrot.slane %v2860_v53, 2  ;;  %v2665_v11 = vpop.f32.mrb[13].mxu0 }
 0x1e6   : > { %v2931_v12 = vrot.slane %v2915_v63, 1  ;;  %v2947_v14 = vrot.slane %v2915_v63, 3  ;;  %v2963_v19 = vrot.slane %v2915_v63, 5  ;;  %v4870_v16 = vmax.f32 %v2861_v60, %v2877_v2 }
 0x1e7   : > { %v2930_v17 = vrot.slane %v2914_v7, 1  ;;  %v2946_v42 = vrot.slane %v2914_v7, 3  ;;  %v2962_v18 = vrot.slane %v2914_v7, 5  ;;  %3006 = vst [vmem:[%s4873_s8] sm:$0x1] %v2978_v8  ;;  %v2892_v20 = vmax.f32 %v2860_v53, %v2876_v43  ;;  %v3635_v25 = vpop.f32.mrb[22].mxu1 }
 0x1e8   : > { %v4877_v21 = vmax.f32 %v4870_v16, %v2901_v9  ;;  %v3832_v24 = vadd.f32 %v2663_v3, %v4820_v6  ;;  %v2839_v27 = vmax.f32 %v2815_v52, %v2831_v40  ;;  %v2855_v28 = vadd.f32 %v3632_v62, %v4847_v22  ;;  %v2669_v29 = vpop.f32.mrb[14].mxu0  ;;  %v2770_v32 = vpop.f32.mrb[23].mxu1 }
 0x1e9   : > { %v2979_v33 = vmax.f32 %v2930_v17, %v2931_v12  ;;  %v2980_v37 = vmax.f32 %v2946_v42, %v2947_v14  ;;  %v2981_v38 = vmax.f32 %v2962_v18, %v2963_v19  ;;  %v2916_v39 = vmax.f32 %v2892_v20, %v2900_v10  ;;  %v2671_v45 = vpop.f32.mrb[15].mxu0 }
 0x1ea   : > { %v2933_v41 = vrot.slane %v4877_v21, 1  ;;  %v2949_v35 = vrot.slane %v4877_v21, 3  ;;  %v2965_v46 = vrot.slane %v4877_v21, 5  ;;  %v2982_v47 = vmax.f32 %v2891_v59, %v2892_v20 }
 0x1eb   : > { %3007 = vst [vmem:[%s4873_s8 + $0x1] sm:$0x1] %v2979_v33  ;;  %3008 = vst [vmem:[%s4873_s8 + $0x2] sm:$0x1] %v2980_v37  ;;  %v2932_v6 = vrot.slane %v2916_v39, 1  ;;  %v2948_v48 = vrot.slane %v2916_v39, 3  ;;  %v2816_v15 = vadd.f32 %v3832_v24, %v4831_v50  ;;  %v2863_v31 = vmax.f32 %v2839_v27, %v2855_v28 }
 0x1ec   : > { %3009 = vst [vmem:[%s4873_s8 + $0x3] sm:$0x1] %v2981_v38  ;;  %v2964_v49 = vrot.slane %v2916_v39, 5  ;;  %v2986_v23 = vmax.f32 %v2982_v47, %v4870_v16  ;;  %v3833_v34 = vadd.f32 %v2665_v11, %v4822_v26  ;;  %v2854_v36 = vadd.f32 %v4847_v22, %v2760_v5 }
 0x1ed   : > { %v2983_v1 = vmax.f32 %v2931_v12, %v2932_v6  ;;  %v2984_v51 = vmax.f32 %v2947_v14, %v2948_v48  ;;  %v3834_v56 = vadd.f32 %v2669_v29, %v4824_v0  ;;  %v2879_v57 = vrot.slane %v2863_v31, 1 }
 0x1ee   : > { %v2985_v54 = vmax.f32 %v2963_v19, %v2964_v49  ;;  %3010 = vst [vmem:[%s4873_s8 + $0x4] sm:$0x1] %v2986_v23  ;;  %v2832_v58 = vadd.f32 %v3833_v34, %v4836_v55  ;;  %v2862_v59 = vmax.f32 %v2838_v4, %v2854_v36  ;;  %v2903_v26 = vrot.slane %v2863_v31, 2 }
 0x1ef   : > { %v2987_v60 = vmax.f32 %v2983_v1, %v2933_v41  ;;  %v2988_v61 = vmax.f32 %v2984_v51, %v2949_v35  ;;  %v2895_v44 = vmax.f32 %v2863_v31, %v2879_v57  ;;  %v2817_v53 = vadd.f32 %v3834_v56, %v4831_v50 }
 0x1f0   : > { %v2989_v13 = vmax.f32 %v2985_v54, %v2965_v46  ;;  %v2878_v52 = vrot.slane %v2862_v59, 1  ;;  %v3835_v62 = vadd.f32 %v2671_v45, %v4826_v30  ;;  %v2840_v63 = vmax.f32 %v2816_v15, %v2832_v58 }
 0x1f1   : > { %3011 = vst [vmem:[%s4873_s8 + $0x5] sm:$0x1] %v2987_v60  ;;  %3012 = vst [vmem:[%s4873_s8 + $0x6] sm:$0x1] %v2988_v61  ;;  %v2856_v0 = vadd.f32 %v4847_v22, %v2770_v32  ;;  %v2919_v2 = vmax.f32 %v2895_v44, %v2903_v26  ;;  %v2902_v40 = vrot.slane %v2862_v59, 2  ;;  %v2857_v7 = vadd.f32 %v3635_v25, %v4847_v22 }
 0x1f2   : > { %3013 = vst [vmem:[%s4873_s8 + $0x7] sm:$0x1] %v2989_v13  ;;  %v2894_v9 = vmax.f32 %v2862_v59, %v2878_v52  ;;  %v2833_v4 = vadd.f32 %v3835_v62, %v4836_v55 }
 0x1f3   : > { %v2864_v3 = vmax.f32 %v2840_v63, %v2856_v0  ;;  %v2935_v8 = vrot.slane %v2919_v2, 1  ;;  %v2951_v11 = vrot.slane %v2919_v2, 3  ;;  %v2967_v20 = vrot.slane %v2919_v2, 5 }
 0x1f4   : > { %v2918_v5 = vmax.f32 %v2894_v9, %v2902_v40  ;;  %v2990_v43 = vmax.f32 %v4870_v16, %v2894_v9  ;;  %v2841_v10 = vmax.f32 %v2817_v53, %v2833_v4 }
 0x1f5   : > { %v2880_v50 = vrot.slane %v2864_v3, 1  ;;  %v2904_v18 = vrot.slane %v2864_v3, 2 }
 0x1f6   : > { %v2934_v30 = vrot.slane %v2918_v5, 1  ;;  %v2950_v12 = vrot.slane %v2918_v5, 3  ;;  %v2966_v14 = vrot.slane %v2918_v5, 5  ;;  %v2994_v19 = vmax.f32 %v2990_v43, %v2895_v44 }
 0x1f7   : > { %v2865_v17 = vmax.f32 %v2841_v10, %v2857_v7  ;;  %v2896_v42 = vmax.f32 %v2864_v3, %v2880_v50 }
 0x1f8   : > { %v2991_v55 = vmax.f32 %v2933_v41, %v2934_v30  ;;  %v2992_v21 = vmax.f32 %v2949_v35, %v2950_v12  ;;  %v2993_v22 = vmax.f32 %v2965_v46, %v2966_v14  ;;  %3014 = vst [vmem:[%s4873_s8 + $0x8] sm:$0x1] %v2994_v19 }
 0x1f9   : > { %v2881_v25 = vrot.slane %v2865_v17, 1  ;;  %v2920_v16 = vmax.f32 %v2896_v42, %v2904_v18  ;;  %v2998_v24 = vmax.f32 %v2895_v44, %v2896_v42  ;;  %v2905_v32 = vrot.slane %v2865_v17, 2 }
 0x1fa   : > { %v2995_v27 = vmax.f32 %v2991_v55, %v2935_v8  ;;  %v2996_v28 = vmax.f32 %v2992_v21, %v2951_v11  ;;  %v2997_v29 = vmax.f32 %v2993_v22, %v2967_v20 }
 0x1fb   : > { %v2897_v33 = vmax.f32 %v2865_v17, %v2881_v25  ;;  %v2936_v37 = vrot.slane %v2920_v16, 1  ;;  %v2952_v38 = vrot.slane %v2920_v16, 3  ;;  %v2968_v39 = vrot.slane %v2920_v16, 5 }
 0x1fc   : > { %3015 = vst [vmem:[%s4873_s8 + $0x9] sm:$0x1] %v2995_v27  ;;  %3016 = vst [vmem:[%s4873_s8 + $0xa] sm:$0x1] %v2996_v28 }
 0x1fd   : > { %3017 = vst [vmem:[%s4873_s8 + $0xb] sm:$0x1] %v2997_v29  ;;  %v2921_v45 = vmax.f32 %v2897_v33, %v2905_v32  ;;  %v2999_v41 = vmax.f32 %v2935_v8, %v2936_v37  ;;  %v3000_v35 = vmax.f32 %v2951_v11, %v2952_v38  ;;  %v3001_v46 = vmax.f32 %v2967_v20, %v2968_v39 }
 0x1fe   : > { %v3002_v47 = vmax.f32 %v2998_v24, %v2897_v33 }
 0x1ff   : > { %v2937_v6 = vrot.slane %v2921_v45, 1  ;;  %v2953_v48 = vrot.slane %v2921_v45, 3  ;;  %v2969_v49 = vrot.slane %v2921_v45, 5 }
 0x200   : > { %3018 = vst [vmem:[%s4873_s8 + $0xc] sm:$0x1] %v3002_v47 }
 0x201   : > { %v3003_v15 = vmax.f32 %v2999_v41, %v2937_v6  ;;  %v3004_v23 = vmax.f32 %v3000_v35, %v2953_v48  ;;  %v3005_v31 = vmax.f32 %v3001_v46, %v2969_v49 }
 0x203   : > { %3019 = vst [vmem:[%s4873_s8 + $0xd] sm:$0x1] %v3003_v15  ;;  %3020 = vst [vmem:[%s4873_s8 + $0xe] sm:$0x1] %v3004_v23 }
 0x204   : > { %3021 = vst [vmem:[%s4873_s8 + $0xf] sm:$0x1] %v3005_v31 }
 0x205   : > { %4110 = shalt.err (!%p4107_p7)
}
 0x206   : > { %s4111_s27 = scalar_lea.hbm %s4913_s19, 256  ;;  %s4115_s30 = scalar_lea.hbm %s4966_s3, 512 }
 0x207   : > { %p4112_p8 = scmp.ne.s32.totalorder %s4913_s19, %s4111_s27  ;;  %p4116_p1 = scmp.lt.u32.totalorder %s4913_s19, %s4966_s3 }
 0x208   : > { %p4117_p0 = scmp.lt.u32.totalorder %s4115_s30, %s4111_s27  ;;  %p4119_p6 = scmp.lt.u32.totalorder %s4111_s27, %s4913_s19 }
 0x209   : > { %p4113_p11 = pnand %p4112_p8, %p4979_p9 }
 0x20a   : > { %p4118_p5 = por %p4117_p0, %p4116_p1 }
 0x20b   : > { %p4114_p13 = pneg %p4113_p11 }
 0x20c   : > { %p4120_p10 = por %p4119_p6, %p4118_p5 }
 0x20e   : > { %p4121_p12 = pnand %p4120_p10, %p4114_p13 }
 0x210   : > { %4124 = shalt.err (!%p4121_p12)
}
 0x211   : > { %s4171_s6 = smov 16   ;;  %s4172_s7 = smov 1  }
 0x212   : > { %4017 = dma.vmem_to_hbm [thread:$0]  (%p4979_p9), %s4915_s10, 256, %s4913_s19, %s4922_s16, %s4171_s6, %s4171_s6, %s4172_s7  }
 0x213 PF: > { %p4029_p2 = scmp.ge.s32.totalorder %s4163_s15, 2  ;;  %s3051_s8 = sand.u32 1, %s4151_s12  }
 0x214   : > { %p4980_p3 = scmp.ne.s32.totalorder %s4971_s23, 0  ;;  %s3052_s9 = scalar_lea.sflag [#allocation4], %s3051_s8 }
 0x216   : > { %p4024_p4 = pnand %p4029_p2, %p4980_p3 }
 0x218   : > { %4146 = dma.done.wait (!%p4024_p4), %s3052_s9, 256  }
 0x219   : > { %4148 = vsyncadd (!%p4024_p4), %s3052_s9, 4294967040  ;;  %p14_p7 = scmp.ge.s32.totalorder %s4218_s18, 4   ;;  %s4981_s12 = smov %s4155_s13 }
 0x21a   : > { %s4982_s13 = smov %s4159_s14  ;;  %s4983_s14 = smov %s4229_s21 }
 0x21b   : > { %s4984_s15 = smov %s4218_s18  ;;  %16 = sbr.rel (!%p14_p7) target bundleno = 4 (0x4), region = 84 }
 0x222   :  { %3057 = vsyncpa [#allocation3], 1 }
 0x223   :  { %3059 = vsyncpa [#allocation3 + $0x1], 1 }
 0x224   :  { %3060 = vsyncpa [#allocation4], 1 }
 0x225   :  { %3062 = vsyncpa [#allocation4 + $0x1], 1 }

</bundles_post_ra>
